<compile_context>
chip_gen: v7x
topology: tpu7x:2x2x1
jax: 0.10.0
libtpu: 0.0.40
codegen_flags: <defaults>
</compile_context>

<pallas_src>
import functools

import jax
import jax.numpy as jnp
import numpy as np
from jax.experimental import pallas as pl
from jax.experimental.pallas import tpu as pltpu


# ----------------------------------------------------------------------------
# Kernel
# ----------------------------------------------------------------------------
def attention_kernel(a_ref, h_ref, w_ref, u_ref, bias_ref, v_ref,
                     ctx_ref, alpha_ref, *, approx_recip):
    TB, L, E = a_ref.shape
    H = w_ref.shape[1]

    a = a_ref[...]                                      # (TB, L, E) compute dtype
    h = h_ref[...]                                      # (TB, H)    compute dtype

    # --- projections (MXU, f32 accumulation) --------------------------------
    # One big (TB*L, E) @ (E, H) matmul fills MXU sublanes.
    wa = jnp.dot(a.reshape(TB * L, E), w_ref[...],
                 preferred_element_type=jnp.float32)                    # (TB*L, H)
    uh = jnp.dot(h, u_ref[...],
                 preferred_element_type=jnp.float32)                    # (TB, H)

    # Single pre-summed bias row (bW + bU) added once, in f32.
    att = jnp.tanh(wa.reshape(TB, L, H) + uh[:, None, :] + bias_ref[...])  # (TB, L, H)

    # --- scores, lane-major: VPU multiply + cross-lane (XLU) reduce ----------
    # e is (TB, L); bV is omitted (softmax shift invariance => no effect).
    e = jnp.sum(att * v_ref[...], axis=-1)                              # (TB, L) f32

    # --- softmax over L (last axis) ------------------------------------------
    e = e - jnp.max(e, axis=-1, keepdims=True)
    p = jnp.exp(e)
    denom = jnp.sum(p, axis=-1, keepdims=True)
    if approx_recip:
        alpha = p * pl.reciprocal(denom, approx=True)                   # EUP slot
    else:
        alpha = p / denom

    # --- context: VPU multiply + sublane reduce (f32 accumulation) -----------
    # alpha stays f32; a (possibly bf16) is promoted elementwise, so the bf16
    # path accumulates in f32 without down-casting alpha.
    ctx = jnp.sum(alpha[:, :, None] * a, axis=1)                        # (TB, E) f32

    ctx_ref[...] = ctx.astype(ctx_ref.dtype)
    alpha_ref[...] = alpha.astype(alpha_ref.dtype)


# ----------------------------------------------------------------------------
# Tile-size / VMEM budgeting helpers
# ----------------------------------------------------------------------------
def _per_batch_vmem_bytes(L, E, H, dtype_bytes):
    """Approx VMEM bytes per batch element for one pipeline stage."""
    return (2 * (L * E + H) * dtype_bytes     # double-buffered a / h input blocks
            + 2 * L * H * 4                   # wa / att f32 intermediates
            + 2 * (E + L) * 4 * 2)            # double-buffered f32 ctx / alpha blocks


def _pick_tb(B, L, E, H, dtype_bytes, align,
             vmem_budget_bytes=20 * 2**20, tb_cap=512):
    per_b = _per_batch_vmem_bytes(L, E, H, dtype_bytes)
    tb = int(vmem_budget_bytes // max(per_b, 1))
    tb = min(tb, tb_cap)
    tb = max(align, (tb // align) * align)
    # No point tiling bigger than the (padded) batch.
    b_ceil = ((B + align - 1) // align) * align
    tb = min(tb, b_ceil)
    tb = max(align, (tb // align) * align)
    # Prefer >= 2 grid steps so the "parallel" batch axis can be split across
    # the two TensorCores when the whole batch would otherwise fit one tile.
    while tb > align and pl.cdiv(B, tb) < 2:
        tb = max(align, ((tb // 2) // align) * align)
    return tb


# ----------------------------------------------------------------------------
# Wrapper
# ----------------------------------------------------------------------------
def attention_forward(a, h, params, *, tb=None, compute_dtype=None,
                      approx_recip=True, vmem_limit_bytes=None):
    """a: (B, L, E) encoder features; h: (B, H) previous hidden state.

    compute_dtype=jnp.bfloat16 is recommended on v6e/v7x (halves HBM traffic);
    matmuls always accumulate in f32 and tanh/exp/softmax stay in f32.
    """
    B, L, E = a.shape
    H = params["U"].shape[0]

    in_dtype = jnp.dtype(compute_dtype) if compute_dtype is not None else jnp.dtype(jnp.float32)
    dtype_bytes = in_dtype.itemsize
    # bf16 packs 16 sublanes per vreg -> require tb % 16; f32 -> tb % 8.
    align = 16 if dtype_bytes < 4 else 8

    if tb is None:
        tb = _pick_tb(B, L, E, H, dtype_bytes, align)
    if tb % align != 0:
        raise ValueError(f"tb={tb} must be a multiple of {align} for dtype {in_dtype}")

    # Pad the batch to a multiple of tb so every block is full (padded rows are
    # zeros -> uniform alpha, zero context; sliced off below).
    Bp = pl.cdiv(B, tb) * tb
    if Bp != B:
        a = jnp.pad(a, ((0, Bp - B), (0, 0), (0, 0)))
        h = jnp.pad(h, ((0, Bp - B), (0, 0)))

    W, U, V = params["W"], params["U"], params["V"]
    if compute_dtype is not None:
        a = a.astype(in_dtype)
        h = h.astype(in_dtype)
        W = W.astype(in_dtype)
        U = U.astype(in_dtype)
    # Biases / V stay f32 (tiny; added/multiplied against f32 accumulators).
    bias = (params["bW"] + params["bU"]).astype(jnp.float32)    # (1, H), bV dropped
    V = V.astype(jnp.float32)

    # Explicit VMEM limit: default scoped VMEM (16/32 MiB) is far below what a
    # large tb wants; clamp to 48 MiB so it is also safe on v7x (64 MiB / TC).
    if vmem_limit_bytes is None:
        weights_bytes = (E * H + H * H) * dtype_bytes + 3 * H * 4
        est = _per_batch_vmem_bytes(L, E, H, dtype_bytes) * tb + weights_bytes + (1 << 20)
        vmem_limit_bytes = min(48 * 2**20, max(32 * 2**20, int(1.5 * est)))

    grid = (Bp // tb,)

    cost = pl.CostEstimate(
        flops=2 * Bp * L * E * H + 2 * Bp * H * H + 2 * Bp * L * H + 2 * Bp * L * E,
        transcendentals=Bp * L * H + Bp * L,
        bytes_accessed=(Bp * L * E + Bp * H) * dtype_bytes
                       + (E * H + H * H) * dtype_bytes + 3 * H * 4
                       + Bp * (E + L) * 4,
    )

    kernel = functools.partial(attention_kernel, approx_recip=approx_recip)

    ctx, alpha = pl.pallas_call(
        kernel,
        out_shape=(jax.ShapeDtypeStruct((Bp, E), jnp.float32),
                   jax.ShapeDtypeStruct((Bp, L), jnp.float32)),
        grid_spec=pltpu.PrefetchScalarGridSpec(
            num_scalar_prefetch=0,
            grid=grid,
            in_specs=[
                pl.BlockSpec((tb, L, E), lambda b: (b, 0, 0)),   # a      (batch block)
                pl.BlockSpec((tb, H), lambda b: (b, 0)),         # hidden (batch block)
                pl.BlockSpec((E, H), lambda b: (0, 0)),          # W      (resident)
                pl.BlockSpec((H, H), lambda b: (0, 0)),          # U      (resident)
                pl.BlockSpec((1, H), lambda b: (0, 0)),          # bias = bW + bU
                pl.BlockSpec((1, H), lambda b: (0, 0)),          # V row
            ],
            out_specs=(pl.BlockSpec((tb, E), lambda b: (b, 0)),  # context
                       pl.BlockSpec((tb, L), lambda b: (b, 0))), # alpha
        ),
        compiler_params=pltpu.CompilerParams(
            dimension_semantics=("parallel",),                   # batch axis -> megacore
            vmem_limit_bytes=vmem_limit_bytes),
        cost_estimate=cost,
    )(a, h, W, U, bias, V)

    return ctx[:B], alpha[:B]


# ----------------------------------------------------------------------------
# Parameter init mirroring the PyTorch module's reset_parameters()
# ----------------------------------------------------------------------------
def init_params(key, encoder_dim, hidden_size):
    ks = jax.random.split(key, 6)
    # hidden_init uses weight.size()[0] == out_features as "fan_in".
    lim_w = 1.0 / np.sqrt(hidden_size)           # affine_W: out_features = hidden
    lim_u = 1.0 / np.sqrt(hidden_size)           # affine_U: out_features = hidden
    # PyTorch Linear weight is (out, in); we store the transpose (in, out).
    W = jax.random.uniform(ks[0], (hidden_size, encoder_dim), jnp.float32, -lim_w, lim_w).T
    U = jax.random.uniform(ks[1], (hidden_size, hidden_size), jnp.float32, -lim_u, lim_u).T
    V = jax.random.uniform(ks[2], (1, hidden_size), jnp.float32, -0.003, 0.003)  # row (1, H)
    # Biases keep the default nn.Linear init: U(-1/sqrt(in_features), +1/sqrt(in_features))
    bW = jax.random.uniform(ks[3], (1, hidden_size), jnp.float32,
                            -1.0 / np.sqrt(encoder_dim), 1.0 / np.sqrt(encoder_dim))
    bU = jax.random.uniform(ks[4], (1, hidden_size), jnp.float32,
                            -1.0 / np.sqrt(hidden_size), 1.0 / np.sqrt(hidden_size))
    bV = jax.random.uniform(ks[5], (1, 1), jnp.float32,
                            -1.0 / np.sqrt(hidden_size), 1.0 / np.sqrt(hidden_size))
    return {"W": W, "bW": bW, "U": U, "bU": bU, "V": V, "bV": bV}


def reference_forward(a, h, p):
    """Pure-JAX reference matching the PyTorch forward exactly (incl. bV)."""
    wa = a @ p["W"] + p["bW"][0]
    uh = h @ p["U"] + p["bU"][0]
    att = jnp.tanh(wa + uh[:, None, :])
    e = jnp.einsum('blh,h->bl', att, p["V"][0]) + p["bV"][0, 0]
    alpha = jax.nn.softmax(e, axis=1)
    ctx = jnp.sum(a * alpha[..., None], axis=1)
    return ctx, alpha


if __name__ == "__main__":
    # batch, num_pixels, encoder_dim, hidden_size
    B, L, E, H = 16, 16, 32, 64

    key = jax.random.PRNGKey(0)
    k_param, k_a, k_h = jax.random.split(key, 3)
    params = init_params(k_param, E, H)
    a = jax.random.normal(k_a, (B, L, E), jnp.float32)
    h = jax.random.normal(k_h, (B, H), jnp.float32)

    ctx_ref, alpha_ref = reference_forward(a, h, params)

    # f32 path (tb auto-picked: 8 here -> grid of 2 so megacore can split it).
    ctx, alpha = attention_forward(a, h, params)
    jax.block_until_ready((ctx, alpha))
    assert ctx.shape == (B, E) and alpha.shape == (B, L)
    assert np.allclose(np.asarray(ctx), np.asarray(ctx_ref), atol=2e-3, rtol=2e-3)
    assert np.allclose(np.asarray(alpha), np.asarray(alpha_ref), atol=2e-3, rtol=2e-3)

    # bf16-input path (v6e/v7x bandwidth optimization); tb auto-picked as a
    # multiple of 16 for packed sublanes; looser tolerance.
    ctx_bf, alpha_bf = attention_forward(a, h, params, compute_dtype=jnp.bfloat16)
    jax.block_until_ready((ctx_bf, alpha_bf))
    assert np.allclose(np.asarray(ctx_bf), np.asarray(ctx_ref), atol=5e-2, rtol=5e-2)
    assert np.allclose(np.asarray(alpha_bf), np.asarray(alpha_ref), atol=5e-2, rtol=5e-2)

    # Exact-softmax option (no approx reciprocal) also runs.
    ctx_ex, alpha_ex = attention_forward(a, h, params, approx_recip=False)
    jax.block_until_ready((ctx_ex, alpha_ex))
    assert np.allclose(np.asarray(alpha_ex), np.asarray(alpha_ref), atol=1e-4, rtol=1e-4)

    print("KERNEL_OK")
</pallas_src>

<mosaic_0001>
module attributes {stable_mosaic.version = 11 : i64} {
  func.func @attention_kernel(%arg0: i32, %arg1: memref<8x16x32xf32, #tpu.memory_space<vmem>>, %arg2: memref<8x64xf32, #tpu.memory_space<vmem>>, %arg3: memref<32x64xf32, #tpu.memory_space<vmem>>, %arg4: memref<64x64xf32, #tpu.memory_space<vmem>>, %arg5: memref<1x64xf32, #tpu.memory_space<vmem>>, %arg6: memref<1x64xf32, #tpu.memory_space<vmem>>, %arg7: memref<8x32xf32, #tpu.memory_space<vmem>>, %arg8: memref<8x16xf32, #tpu.memory_space<vmem>>) attributes {dimension_semantics = [#tpu.dimension_semantics<parallel>], iteration_bounds = array<i64: 2>, scalar_prefetch = 0 : i64, scratch_operands = 0 : i64, tpu.core_type = #tpu.core_type<tc>, window_params = [{transform_indices = @transform_0, window_bounds = array<i64: 8, 16, 32>}, {transform_indices = @transform_1, window_bounds = array<i64: 8, 64>}, {pipeline_mode = #tpu.pipeline_mode<synchronous>, transform_indices = @transform_2, window_bounds = array<i64: 32, 64>}, {pipeline_mode = #tpu.pipeline_mode<synchronous>, transform_indices = @transform_3, window_bounds = array<i64: 64, 64>}, {pipeline_mode = #tpu.pipeline_mode<synchronous>, transform_indices = @transform_4, window_bounds = array<i64: 1, 64>}, {pipeline_mode = #tpu.pipeline_mode<synchronous>, transform_indices = @transform_5, window_bounds = array<i64: 1, 64>}, {transform_indices = @transform_6, window_bounds = array<i64: 8, 32>}, {transform_indices = @transform_7, window_bounds = array<i64: 8, 16>}]} {
    %c0 = arith.constant 0 : index
    %c0_0 = arith.constant 0 : index
    %c0_1 = arith.constant 0 : index
    %0 = vector.load %arg1[%c0, %c0_0, %c0_1] : memref<8x16x32xf32, #tpu.memory_space<vmem>>, vector<8x16x32xf32>
    %c0_2 = arith.constant 0 : index
    %c0_3 = arith.constant 0 : index
    %1 = vector.load %arg2[%c0_2, %c0_3] : memref<8x64xf32, #tpu.memory_space<vmem>>, vector<8x64xf32>
    %2 = vector.shape_cast %0 : vector<8x16x32xf32> to vector<128x32xf32>
    %c0_4 = arith.constant 0 : index
    %c0_5 = arith.constant 0 : index
    %3 = vector.load %arg3[%c0_4, %c0_5] : memref<32x64xf32, #tpu.memory_space<vmem>>, vector<32x64xf32>
    %cst = arith.constant dense<0.000000e+00> : vector<128x64xf32>
    %4 = tpu.matmul %2, %3, %cst {dimension_numbers = #tpu.dot_dimension_numbers<[1], [0], [0], [1], [0, 0, 1, 1], [], []>} : vector<128x32xf32>, vector<32x64xf32>, vector<128x64xf32> -> vector<128x64xf32>
    %c0_6 = arith.constant 0 : index
    %c0_7 = arith.constant 0 : index
    %5 = vector.load %arg4[%c0_6, %c0_7] : memref<64x64xf32, #tpu.memory_space<vmem>>, vector<64x64xf32>
    %cst_8 = arith.constant dense<0.000000e+00> : vector<8x64xf32>
    %6 = tpu.matmul %1, %5, %cst_8 {dimension_numbers = #tpu.dot_dimension_numbers<[1], [0], [0], [1], [0, 0, 1, 1], [], []>} : vector<8x64xf32>, vector<64x64xf32>, vector<8x64xf32> -> vector<8x64xf32>
    %7 = vector.shape_cast %4 : vector<128x64xf32> to vector<8x16x64xf32>
    %8 = vector.shape_cast %6 : vector<8x64xf32> to vector<8x1x64xf32>
    %9 = vector.broadcast %8 : vector<8x1x64xf32> to vector<8x16x64xf32>
    %10 = arith.addf %7, %9 : vector<8x16x64xf32>
    %c0_9 = arith.constant 0 : index
    %c0_10 = arith.constant 0 : index
    %11 = vector.load %arg5[%c0_9, %c0_10] : memref<1x64xf32, #tpu.memory_space<vmem>>, vector<1x64xf32>
    %12 = vector.shape_cast %11 : vector<1x64xf32> to vector<1x1x64xf32>
    %13 = vector.broadcast %12 : vector<1x1x64xf32> to vector<8x16x64xf32>
    %14 = arith.addf %10, %13 : vector<8x16x64xf32>
    %15 = math.tanh %14 : vector<8x16x64xf32>
    %c0_11 = arith.constant 0 : index
    %c0_12 = arith.constant 0 : index
    %16 = vector.load %arg6[%c0_11, %c0_12] : memref<1x64xf32, #tpu.memory_space<vmem>>, vector<1x64xf32>
    %17 = vector.shape_cast %16 : vector<1x64xf32> to vector<1x1x64xf32>
    %18 = vector.broadcast %17 : vector<1x1x64xf32> to vector<8x16x64xf32>
    %19 = arith.mulf %15, %18 : vector<8x16x64xf32>
    %cst_13 = arith.constant dense<0.000000e+00> : vector<8x16xf32>
    %20 = vector.multi_reduction <add>, %19, %cst_13 [2] : vector<8x16x64xf32> to vector<8x16xf32>
    %cst_14 = arith.constant dense<0xFF800000> : vector<8xf32>
    %21 = vector.multi_reduction <maximumf>, %20, %cst_14 [1] : vector<8x16xf32> to vector<8xf32>
    %22 = vector.shape_cast %21 : vector<8xf32> to vector<8x1xf32>
    %23 = vector.broadcast %22 : vector<8x1xf32> to vector<8x16xf32>
    %24 = arith.subf %20, %23 : vector<8x16xf32>
    %25 = math.exp %24 : vector<8x16xf32>
    %cst_15 = arith.constant dense<0.000000e+00> : vector<8xf32>
    %26 = vector.multi_reduction <add>, %25, %cst_15 [1] : vector<8x16xf32> to vector<8xf32>
    %27 = vector.shape_cast %26 : vector<8xf32> to vector<8x1xf32>
    %28 = tpu.reciprocal %27 {approx = true} : vector<8x1xf32> -> vector<8x1xf32>
    %29 = vector.broadcast %28 : vector<8x1xf32> to vector<8x16xf32>
    %30 = arith.mulf %25, %29 : vector<8x16xf32>
    %31 = vector.shape_cast %30 : vector<8x16xf32> to vector<8x16x1xf32>
    %32 = vector.broadcast %31 : vector<8x16x1xf32> to vector<8x16x32xf32>
    %33 = arith.mulf %32, %0 : vector<8x16x32xf32>
    %cst_16 = arith.constant dense<0.000000e+00> : vector<8x32xf32>
    %34 = vector.multi_reduction <add>, %33, %cst_16 [1] : vector<8x16x32xf32> to vector<8x32xf32>
    %c0_17 = arith.constant 0 : index
    %c0_18 = arith.constant 0 : index
    %35 = vector.load %arg7[%c0_17, %c0_18] : memref<8x32xf32, #tpu.memory_space<vmem>>, vector<8x32xf32>
    tpu.vector_store %arg7[%c0_17, %c0_18], %34 {strides = array<i32>} : memref<8x32xf32, #tpu.memory_space<vmem>>, vector<8x32xf32>,
    %c0_19 = arith.constant 0 : index
    %c0_20 = arith.constant 0 : index
    %36 = vector.load %arg8[%c0_19, %c0_20] : memref<8x16xf32, #tpu.memory_space<vmem>>, vector<8x16xf32>
    tpu.vector_store %arg8[%c0_19, %c0_20], %30 {strides = array<i32>} : memref<8x16xf32, #tpu.memory_space<vmem>>, vector<8x16xf32>,
    return
  }
  func.func @transform_0(%arg0: i32) -> (i32, i32, i32) {
    %c0_i32 = arith.constant 0 : i32
    %c0_i32_0 = arith.constant 0 : i32
    %c0_i32_1 = arith.constant 0 : i32
    return %arg0, %c0_i32, %c0_i32_0 : i32, i32, i32
  }
  func.func @transform_1(%arg0: i32) -> (i32, i32) {
    %c0_i32 = arith.constant 0 : i32
    %c0_i32_0 = arith.constant 0 : i32
    return %arg0, %c0_i32 : i32, i32
  }
  func.func @transform_2(%arg0: i32) -> (i32, i32) {
    %c0_i32 = arith.constant 0 : i32
    %c0_i32_0 = arith.constant 0 : i32
    %c0_i32_1 = arith.constant 0 : i32
    return %c0_i32, %c0_i32_0 : i32, i32
  }
  func.func @transform_3(%arg0: i32) -> (i32, i32) {
    %c0_i32 = arith.constant 0 : i32
    %c0_i32_0 = arith.constant 0 : i32
    %c0_i32_1 = arith.constant 0 : i32
    return %c0_i32, %c0_i32_0 : i32, i32
  }
  func.func @transform_4(%arg0: i32) -> (i32, i32) {
    %c0_i32 = arith.constant 0 : i32
    %c0_i32_0 = arith.constant 0 : i32
    %c0_i32_1 = arith.constant 0 : i32
    return %c0_i32, %c0_i32_0 : i32, i32
  }
  func.func @transform_5(%arg0: i32) -> (i32, i32) {
    %c0_i32 = arith.constant 0 : i32
    %c0_i32_0 = arith.constant 0 : i32
    %c0_i32_1 = arith.constant 0 : i32
    return %c0_i32, %c0_i32_0 : i32, i32
  }
  func.func @transform_6(%arg0: i32) -> (i32, i32) {
    %c0_i32 = arith.constant 0 : i32
    %c0_i32_0 = arith.constant 0 : i32
    return %arg0, %c0_i32 : i32, i32
  }
  func.func @transform_7(%arg0: i32) -> (i32, i32) {
    %c0_i32 = arith.constant 0 : i32
    %c0_i32_0 = arith.constant 0 : i32
    return %arg0, %c0_i32 : i32, i32
  }
}

</mosaic_0001>

<bundles_post_ra>
// kernel: tpu_custom_call.1
= control target key start
LH: loop header
LB: loop body
LE: loop exit
PB: predicated region body
PF: predicated region fallthrough
CT: control target
= control target key end

     0   :  { %s3164_s0 = inlined_call_operand.hbm [shape: f32[16,16,32], index: 0, kind: input, shape index: {}]   ;;  %s3165_s1 = inlined_call_operand.hbm [shape: f32[16,64], index: 1, kind: input, shape index: {}]   ;;  %s3166_s2 = inlined_call_operand.hbm [shape: f32[32,64], index: 2, kind: input, shape index: {}]   ;;  %s3167_s3 = inlined_call_operand.hbm [shape: f32[64,64], index: 3, kind: input, shape index: {}]   ;;  %s3168_s4 = inlined_call_operand.vmem [shape: f32[1,64], index: 4, kind: input, shape index: {}]   ;;  %s3169_s5 = inlined_call_operand.vmem [shape: f32[1,64], index: 5, kind: input, shape index: {}]   ;;  %s3170_s6 = inlined_call_operand.hbm [shape: f32[16,32], index: 6, kind: output, shape index: {0}]   ;;  %s3171_s7 = inlined_call_operand.hbm [shape: f32[16,16], index: 7, kind: output, shape index: {1}]  }
   0x1   :  { %3181 = sst [smem:[#allocation21_spill]] %s3164_s0 }
   0x2   :  { %3182 = sst [smem:[#allocation22_spill]] %s3166_s2 }
   0x3   :  { %3183 = sst [smem:[#allocation23_spill]] %s3167_s3 }
   0x4   :  { %13 = vsyncpa [#allocation3], 0 }
   0x5   :  { %15 = vsyncpa [#allocation3 + $0x1], 0 }
   0x6   :  { %16 = vsyncpa [#allocation6], 0 }
   0x7   :  { %18 = vsyncpa [#allocation6 + $0x1], 0 }
   0x8   :  { %19 = vsyncpa [#allocation9], 0 }
   0x9   :  { %20 = vsyncpa [#allocation4], 0 }
   0xa   :  { %22 = vsyncpa [#allocation4 + $0x1], 0 }
   0xb   :  { %23 = vsyncpa [#allocation12], 0 }
   0xc   :  { %25 = vsyncpa [#allocation12 + $0x1], 0  ;;  %s2315_s24 = smov 0   ;;  %s2317_s25 = smov 0  }
   0xd   :  { %s2319_s26 = smov 0   ;;  %s2321_s27 = smov 0  }
   0xe LB: > { %3184 = sst [smem:[#allocation19_spill]] %s2256_s26  ;;  %s2336_s28 = sadd.s32 4294967295, %s2260_s27   ;;  %s2260_s27 = sphi %s2321_s27, %s3214_s27   ;;  %s2256_s26 = sphi %s2319_s26, %s3211_s26   ;;  %s2252_s25 = sphi %s2317_s25, %s3213_s25   ;;  %s2248_s24 = sphi %s2315_s24, %s3212_s24  }
   0xf   : > { %s1736_s29 = sadd.s32 4294967294, %s2260_s27   ;;  %p51_p0 = scmp.ne.s32.totalorder %s2252_s25, %s2248_s24 }
  0x10   : > { %p3172_p1 = scmp.eq.s32.totalorder %s2336_s28, 0  ;;  %p191_p3 = scmp.eq.s32.totalorder %s1736_s29, 1 }
  0x11   : > { %p1737_p5 = scmp.ge.s32.totalorder %s2260_s27, 1  ;;  %p224_p7 = scmp.lt.s32.totalorder %s2260_s27, 3 }
  0x12   : > { %p2345_p4 = por %p3172_p1, %p51_p0  ;;  %p2350_p6 = por %p191_p3, %p51_p0 }
  0x13   : > { %p2355_p8 = pnand %p1737_p5, %p224_p7  ;;  %s2262_s10 = smov [#allocation7]  }
  0x14   : > { %s3185_s30 = scalar_select %p2345_p4, 1, 0 }
  0x15   : > { %s3186_s8 = scalar_select %p2350_p6, 1, 0 }
  0x16   : > { %s3187_s9 = scalar_select %p2355_p8, 1, 0 }
  0x17   : > { %s236_s11 = sshll.u32 %s2262_s10, 4  ;;  %p1897_p9 = pneg %p2355_p8  ;;  %s2359_s11 = int_to_ptr.vmem [resolvable:$true] %s236_s11 }
  0x18   : > { %s2263_s13 = smov [#allocation8]   ;;  %s3189_s2 = sld [smem:[#allocation22_spill]] }
  0x19   : > { %p2366_p11 = pnand %p1897_p9, %p3172_p1  ;;  %s249_s14 = sshll.u32 %s2263_s13, 4  ;;  %s2370_s14 = int_to_ptr.vmem [resolvable:$true] %s249_s14 }
  0x1b   : > { %p2036_p13 = pneg %p2366_p11 }
  0x1e   : > { %s2034_s17 = scalar_lea.hbm %s3189_s2, 512 }
  0x1f   : > { %p2035_p12 = scmp.ne.s32.totalorder %s3189_s2, %s2034_s17  ;;  %p2041_p5 = scmp.lt.u32.totalorder %s2034_s17, %s3189_s2 }
  0x21   : > { %p2037_p0 = pnand %p2036_p13, %p2035_p12 }
  0x23   : > { %p2038_p3 = pneg %p2037_p0 }
  0x25   : > { %p2043_p7 = pnand %p2041_p5, %p2038_p3 }
  0x27   : > { %2046 = shalt.err (!%p2043_p7)
}
  0x28   : > { %s2047_s22 = scalar_lea.vmem %s2359_s11, 512  ;;  %p2055_p2 = scmp.lt.s32.totalorder %s2359_s11, %s2359_s11 }
  0x29   : > { %p2048_p9 = scmp.ne.s32.totalorder %s2359_s11, %s2047_s22  ;;  %p2056_p12 = scmp.lt.s32.totalorder %s2047_s22, %s2047_s22 }
  0x2b   : > { %p2050_p10 = pnand %p2048_p9, %p2036_p13  ;;  %p2057_p0 = por %p2056_p12, %p2055_p2 }
  0x2d   : > { %p2051_p1 = pneg %p2050_p10 }
  0x2f   : > { %p2058_p6 = pnand %p2057_p0, %p2051_p1 }
  0x31   : > { %2061 = shalt.err (!%p2058_p6)
}
  0x32   : > { %s3173_s23 = smov 128   ;;  %s3174_s29 = smov 8  }
  0x33   : > { %1900 = dma.hbm_to_vmem [thread:$0]  (!%p2366_p11), %s3189_s2, 512, %s2359_s11, [#allocation6], %s3173_s23, %s3173_s23, %s3174_s29  }
  0x34   : > { %s3190_s3 = sld [smem:[#allocation23_spill]] }
  0x3a   : > { %s2062_s17 = scalar_lea.hbm %s3190_s3, 1024 }
  0x3b   : > { %p2063_p1 = scmp.ne.s32.totalorder %s3190_s3, %s2062_s17  ;;  %p2069_p10 = scmp.lt.u32.totalorder %s2062_s17, %s3190_s3 }
  0x3d   : > { %p2065_p2 = pnand %p2063_p1, %p2036_p13 }
  0x3f   : > { %p2066_p6 = pneg %p2065_p2 }
  0x41   : > { %p2071_p3 = pnand %p2069_p10, %p2066_p6 }
  0x43   : > { %2074 = shalt.err (!%p2071_p3)
}
  0x44   : > { %s2075_s11 = scalar_lea.vmem %s2370_s14, 1024  ;;  %p2083_p12 = scmp.lt.s32.totalorder %s2370_s14, %s2370_s14 }
  0x45   : > { %p2076_p5 = scmp.ne.s32.totalorder %s2370_s14, %s2075_s11  ;;  %p2084_p0 = scmp.lt.s32.totalorder %s2075_s11, %s2075_s11 }
  0x47   : > { %p2078_p7 = pnand %p2076_p5, %p2036_p13  ;;  %p2085_p1 = por %p2084_p0, %p2083_p12 }
  0x49   : > { %p2079_p9 = pneg %p2078_p7 }
  0x4b   : > { %p2086_p2 = pnand %p2085_p1, %p2079_p9 }
  0x4d   : > { %2089 = shalt.err (!%p2086_p2)
}
  0x4e   : > { %1903 = dma.hbm_to_vmem [thread:$0]  (!%p2366_p11), %s3190_s3, 1024, %s2370_s14, [#allocation9], %s3173_s23, %s3173_s23, %s3174_s29  }
  0x4f   : > { %s2431_s12 = sadd.s32 1, %s2260_s27   ;;  %s38_s13 = sadd.s32 1, %s2256_s26 }
  0x50   : > { %s35_s15 = ssub.s32 %s2260_s27, %s2431_s12  ;;  %p45_p13 = scmp.ne.s32.totalorder %s2256_s26, %s2252_s25 }
  0x51   : > { %p36_p6 = scmp.eq.s32.totalorder %s35_s15, 0  ;;  %p46_p10 = scmp.eq.s32.totalorder %s2260_s27, 0 }
  0x52   : > { %p3191_p3 = scmp.eq.s32.totalorder %s2336_s28, 1  ;;  %p1920_p7 = scmp.lt.s32.totalorder %s2260_s27, 2 }
  0x53   : > { %s2447_s17 = scalar_select %p36_p6, %s2256_s26, %s38_s13  }
  0x54   : > { %p2441_p5 = por %p3191_p3, %p45_p13  ;;  %p47_p9 = por %p46_p10, %p45_p13 }
  0x55   : > { %3193 = sst [smem:[#allocation20_spill]] %s2447_s17  ;;  %s2450_s18 = sand.u32 1, %s2256_s26  }
  0x56   : > { %s3192_s16 = scalar_select %p2441_p5, 1, 0 }
  0x57   : > { %s1741_s14 = sshll.u32 %s2450_s18, 7  ;;  %s1780_s19 = sshll.u32 %s2260_s27, 11 }
  0x58   : > { %s3194_s0 = sld [smem:[#allocation21_spill]]  ;;  %s273_s22 = scalar_lea.vmem [#allocation2], %s1741_s14 }
  0x59   : > { %s281_s10 = sshll.u32 %s273_s22, 4  ;;  %p2461_p11 = pnand %p1920_p7, %p47_p9  ;;  %s2459_s10 = int_to_ptr.vmem [resolvable:$true] %s281_s10 }
  0x5a   : > { %s1745_s23 = sshll.u32 %s2450_s18, 3  ;;  %s270_s29 = scalar_lea.sflag [#allocation3], %s2450_s18 }
  0x5b   : > { %p2092_p0 = pneg %p2461_p11 }
  0x5e   : > { %s2457_s11 = scalar_lea.hbm %s3194_s0, %s1780_s19  ;;  %s2095_s21 = scalar_lea.hbm %s3194_s0, 4096 }
  0x5f   : > { %s2090_s20 = scalar_lea.hbm %s2457_s11, 2048  ;;  %p2096_p13 = scmp.lt.u32.totalorder %s2457_s11, %s3194_s0 }
  0x60   : > { %p2091_p12 = scmp.ne.s32.totalorder %s2457_s11, %s2090_s20  ;;  %p2097_p6 = scmp.lt.u32.totalorder %s2095_s21, %s2090_s20 }
  0x61   : > { %p2099_p3 = scmp.lt.u32.totalorder %s2090_s20, %s2457_s11 }
  0x62   : > { %p2093_p1 = pnand %p2092_p0, %p2091_p12  ;;  %p2098_p10 = por %p2097_p6, %p2096_p13 }
  0x64   : > { %p2094_p2 = pneg %p2093_p1  ;;  %p2100_p7 = por %p2099_p3, %p2098_p10 }
  0x66   : > { %p2101_p9 = pnand %p2100_p7, %p2094_p2 }
  0x68   : > { %2104 = shalt.err (!%p2101_p9)
}
  0x69   : > { %s2105_s15 = scalar_lea.vmem %s2459_s10, 2048  ;;  %s2266_s14 = smov [#allocation2]  }
  0x6a   : > { %p2106_p12 = scmp.ne.s32.totalorder %s2459_s10, %s2105_s15  ;;  %s2110_s19 = sshll.u32 %s2266_s14, 4  ;;  %s2111_s19 = int_to_ptr.vmem [resolvable:$false] %s2110_s19 }
  0x6b   : > { %s2112_s2 = scalar_lea.vmem %s2111_s19, 4096  ;;  %p2113_p4 = scmp.lt.s32.totalorder %s2459_s10, %s2111_s19 }
  0x6c   : > { %p2108_p1 = pnand %p2106_p12, %p2092_p0  ;;  %p2114_p13 = scmp.lt.s32.totalorder %s2112_s2, %s2105_s15 }
  0x6e   : > { %p2109_p5 = pneg %p2108_p1  ;;  %p2115_p6 = por %p2114_p13, %p2113_p4 }
  0x70   : > { %p2116_p10 = pnand %p2115_p6, %p2109_p5 }
  0x72   : > { %2119 = shalt.err (!%p2116_p10)
}
  0x73   : > { %s3196_s20 = smov 8   ;;  %s3197_s21 = smov 128  }
  0x74   : > { %1907 = dma.hbm_to_vmem [thread:$0]  (!%p2461_p11), %s2457_s11, 2048, %s2459_s10, %s270_s29, %s3197_s21, %s3197_s21, %s3196_s20  }
  0x75   : > { %s1746_s22 = sshll.u32 %s2260_s27, 7  ;;  %s295_s2 = scalar_lea.vmem [#allocation5], %s1745_s23 }
  0x76   : > { %s2502_s19 = scalar_lea.hbm %s3165_s1, %s1746_s22  ;;  %s302_s0 = sshll.u32 %s295_s2, 4  ;;  %s303_s0 = int_to_ptr.vmem [resolvable:$true] %s302_s0 }
  0x77   : > { %s3198_s3 = sand.u32 1, %s2260_s27   ;;  %s2120_s26 = scalar_lea.hbm %s2502_s19, 128 }
  0x78   : > { %s292_s17 = scalar_lea.sflag [#allocation6], %s3198_s3  ;;  %p2121_p4 = scmp.ne.s32.totalorder %s2502_s19, %s2120_s26 }
  0x79   : > { %s2125_s10 = scalar_lea.hbm %s3165_s1, 256  ;;  %p2126_p3 = scmp.lt.u32.totalorder %s2502_s19, %s3165_s1 }
  0x7a   : > { %p2123_p5 = pnand %p2121_p4, %p2092_p0  ;;  %p2127_p7 = scmp.lt.u32.totalorder %s2125_s10, %s2120_s26 }
  0x7b   : > { %p2129_p12 = scmp.lt.u32.totalorder %s2120_s26, %s2502_s19 }
  0x7c   : > { %p2124_p2 = pneg %p2123_p5  ;;  %p2128_p9 = por %p2127_p7, %p2126_p3 }
  0x7e   : > { %p2130_p1 = por %p2129_p12, %p2128_p9 }
  0x80   : > { %p2131_p13 = pnand %p2130_p1, %p2124_p2 }
  0x82   : > { %2134 = shalt.err (!%p2131_p13)
}
  0x83   : > { %s2135_s3 = scalar_lea.vmem %s303_s0, 128  ;;  %s2267_s23 = smov [#allocation5]  }
  0x84   : > { %p2136_p6 = scmp.ne.s32.totalorder %s303_s0, %s2135_s3  ;;  %s2140_s21 = sshll.u32 %s2267_s23, 4  ;;  %s2141_s21 = int_to_ptr.vmem [resolvable:$false] %s2140_s21 }
  0x85   : > { %s2142_s22 = scalar_lea.vmem %s2141_s21, 256  ;;  %p2143_p5 = scmp.lt.s32.totalorder %s303_s0, %s2141_s21 }
  0x86   : > { %p2138_p10 = pnand %p2136_p6, %p2092_p0  ;;  %p2144_p8 = scmp.lt.s32.totalorder %s2142_s22, %s2135_s3 }
  0x88   : > { %p2139_p4 = pneg %p2138_p10  ;;  %p2145_p3 = por %p2144_p8, %p2143_p5 }
  0x8a   : > { %p2146_p7 = pnand %p2145_p3, %p2139_p4 }
  0x8c   : > { %2149 = shalt.err (!%p2146_p7)
}
  0x8d   : > { %1910 = dma.hbm_to_vmem [thread:$0]  (!%p2461_p11), %s2502_s19, 128, %s303_s0, %s292_s17  }
  0x8e   : > { %p3199_p2 = scmp.ne.s32.totalorder %s3187_s9, 0 }
  0x8f   : > { %s2530_s26 = sand.u32 (!%p3199_p2), 1, %s2252_s25   ;;  %p3200_p8 = scmp.ne.s32.totalorder (!%p3199_p2), %s3185_s30, 0 }
  0x90   : > { %311 = sbr.rel (%p3199_p2) target bundleno = 1313 (0x521), region = 44  ;;  %s1748_s14 = sshll.u32 (!%p3199_p2), %s2530_s26, 7 }
  0x91   : > { %s314_s15 = scalar_lea.sflag (!%p3199_p2), [#allocation3], %s2530_s26  ;;  %s2534_s2 = scalar_lea.vmem (!%p3199_p2), [#allocation2], %s1748_s14 }
  0x97   : > { %2223 = dma.done.wait (%p3200_p8), %s314_s15, 2048  }
  0x98   : > { %2225 = vsyncadd (%p3200_p8), %s314_s15, 4294965248  ;;  %s322_s0 = sand.u32 1, %s2336_s28   ;;  %s2542_s9 = sshll.u32 %s2530_s26, 3 }
  0x99   : > { %s323_s17 = scalar_lea.sflag [#allocation6], %s322_s0  ;;  %s326_s13 = scalar_lea.vmem [#allocation5], %s2542_s9 }
  0x9a   : > { %2227 = dma.done.wait (%p3200_p8), %s323_s17, 128  }
  0x9b   : > { %2229 = vsyncadd (%p3200_p8), %s323_s17, 4294967168  ;;  %p3201_p11 = scmp.eq.s32.totalorder %s2336_s28, 0 }
  0x9d   : > { %2231 = dma.done.wait (%p3201_p11), [#allocation6], 512   ;;  %p3202_p0 = pmov %p3201_p11 }
  0x9f   : > { %2233 = vsyncadd (%p3202_p0), [#allocation6], 4294966784  ;;  %p3203_p9 = pmov %p3202_p0 }
  0xa0   : > { %p3204_p12 = pmov %p3202_p0 }
  0xa1   : > { %2235 = dma.done.wait (%p3203_p9), [#allocation9], 1024  }
  0xa2   : > { %2237 = vsyncadd (%p3204_p12), [#allocation9], 4294966272  ;;  %v2268_v0 = vmov 0.0|0.0   ;;  %vm2269_vm0 = vmmov 0   ;;  %v2270_v1 = vmov 0.0   ;;  %v393_v2 = vld [vmem:[#allocation7] sm:$0xff]  ;;  %v678_v39 = vlaneseq }
  0xa3   : > { %1869 = vmatprep.subr.bf16.mxu1 %v2268_v0  ;;  %1858 = vmatprep.mubr.msk.f32.mxu1 %vm2269_vm0, %v2270_v1  ;;  %v394_v3 = vld [vmem:[#allocation7 + $0x8] sm:$0xff]  ;;  %v591_v4 = vld [vmem:[#allocation8] sm:$0xff]  ;;  %vm397_vm1 = vcmask 261120   ;;  %v395_v7 = vld [vmem:[#allocation7 + $0x10] sm:$0xff]  ;;  %vm599_vm2 = vcmask 523264   ;;  %vm916_vm3 = vcmask 130112  }
  0xa4   : > { %v1861_v5 = vpack.c.bf16 %v394_v3, %v393_v2  ;;  %v592_v6 = vld [vmem:[#allocation8 + $0x8] sm:$0xff]  ;;  %v396_v8 = vld [vmem:[#allocation7 + $0x18] sm:$0xff]  ;;  %v593_v11 = vld [vmem:[#allocation8 + $0x10] sm:$0xff]  ;;  %v2271_v37 = vmov 1966171168   ;;  %v2638_v42 = vshrl.u32 %v678_v39, 7 }
  0xa5   : > { %v1870_v9 = vpack.c.bf16 %v592_v6, %v591_v4  ;;  %v1865_v10 = vpack.c.bf16 %v396_v8, %v395_v7  ;;  %v594_v12 = vld [vmem:[#allocation8 + $0x18] sm:$0xff]  ;;  %v2558_v13 = vld [vmem:[%s2534_s2] sm:$0xff]  ;;  %v595_v15 = vld [vmem:[#allocation8 + $0x20] sm:$0xff]  ;;  %v676_v38 = vunpack.c.l.s4 %v2271_v37  ;;  %vm981_vm4 = vcmask 1041409   ;;  %s1775_s10 = sshll.u32 %s2336_s28, 7  ;;  %s374_s18 = scalar_lea.vmem [#allocation11], %s2542_s9 }
  0xa6   : > { %1862 = vmatprep.subr.bf16.mxu0 %v1861_v5  ;;  %1818 = vmatprep.mubr.msk.f32.mxu0 %vm397_vm1, %v2558_v13  ;;  %v1873_v14 = vpack.c.bf16 %v594_v12, %v593_v11  ;;  %v596_v16 = vld [vmem:[#allocation8 + $0x28] sm:$0xff]  ;;  %v2563_v17 = vld [vmem:[%s2534_s2 + $0x8] sm:$0xff]  ;;  %v2566_v19 = vld [vmem:[%s2534_s2 + $0x10] sm:$0xff]  ;;  %v2642_v51 = vsub.s32 0, %v2638_v42  ;;  %vm983_vm5 = vcmask 1042434   ;;  %vm985_vm6 = vcmask 1043459   ;;  %s3074_s21 = scalar_lea.hbm %s3171_s7, %s1775_s10 }
  0xa7   : > { %1871 = vmatpush3.bf16.msra.mxu1 %v1870_v9  ;;  %1864 = vmatpush3.bf16.msra.mxu0 %v1861_v5  ;;  %v1876_v18 = vpack.c.bf16 %v596_v16, %v595_v15  ;;  %v597_v20 = vld [vmem:[#allocation8 + $0x30] sm:$0xff]  ;;  %v598_v21 = vld [vmem:[#allocation8 + $0x38] sm:$0xff]  ;;  %v2573_v22 = vld [vmem:[%s2534_s2 + $0x18] sm:$0xff]  ;;  %v677_v41 = vunpack.c.0.s8 %v676_v38  ;;  %vm987_vm7 = vcmask 1044484   ;;  %vm989_vm8 = vcmask 1045509   ;;  %s1592_s20 = sshll.u32 %s374_s18, 4  ;;  %s3076_s20 = int_to_ptr.vmem [resolvable:$true] %s1592_s20 }
  0xa8   : > { %1872 = vmatprep.subr.bf16.mxu1 %v2268_v0  ;;  %1866 = vmatprep.subr.bf16.mxu0 %v1865_v10  ;;  %v1879_v23 = vpack.c.bf16 %v598_v21, %v597_v20  ;;  %v2576_v24 = vld [vmem:[%s2534_s2 + $0x20] sm:$0xff]  ;;  %v2585_v26 = vld [vmem:[%s2534_s2 + $0x28] sm:$0xff]  ;;  %v2588_v27 = vld [vmem:[%s2534_s2 + $0x30] sm:$0xff]  ;;  %vm991_vm9 = vcmask 1046534   ;;  %vm993_vm10 = vcmask 1047559   ;;  %vm996_vm11 = vcmask 130048  }
  0xa9   : > { %v392_v25 = vld [vmem:[%s326_s13] sm:$0xff]  ;;  %v2596_v28 = vld [vmem:[%s2534_s2 + $0x38] sm:$0xff]  ;;  %v2609_v31 = vld [vmem:[%s2534_s2 + $0x50] sm:$0xff]  ;;  %v680_v45 = vsub.s32 %v677_v41, %v2638_v42  ;;  %s1566_s22 = scalar_lea.sflag [#allocation12], %s2530_s26  ;;  %s2150_s14 = scalar_lea.vmem %s3076_s20, 128 }
  0xaa   : > { %v2599_v29 = vld [vmem:[%s2534_s2 + $0x40] sm:$0xff]  ;;  %v2606_v30 = vld [vmem:[%s2534_s2 + $0x48] sm:$0xff]  ;;  %v2616_v32 = vld [vmem:[%s2534_s2 + $0x58] sm:$0xff]  ;;  %p2151_p1 = scmp.ne.s32.totalorder %s3076_s20, %s2150_s14  ;;  %p3207_p13 = scmp.ne.s32.totalorder %s3192_s16, 0 }
  0xab   : > { %1874 = vmatpush3.bf16.msra.mxu1 %v1873_v14  ;;  %1868 = vmatpush3.bf16.msra.mxu0 %v1865_v10  ;;  %v2619_v33 = vld [vmem:[%s2534_s2 + $0x60] sm:$0xff]  ;;  %v2626_v34 = vld [vmem:[%s2534_s2 + $0x68] sm:$0xff]  ;;  %v2629_v35 = vld [vmem:[%s2534_s2 + $0x70] sm:$0xff]  ;;  %s2273_s15 = smov [#allocation11]  }
  0xac   : > { %1875 = vmatprep.subr.bf16.mxu1 %v2268_v0  ;;  %v391_v36 = vld [vmem:[%s2534_s2 + $0x78] sm:$0xff]  ;;  %v2648_v63 = vld [vmem:[%s3168_s4] ss:$0 sm:$0xff]  ;;  %p2152_p6 = pnand %p2151_p1, %p3207_p13 }
  0xae   : > { %1819 = vmatmul.mubr.msk.f32.vlgmr.msra.gmra.mrb[0].mxu0 %vm397_vm1, %v2563_v17  ;;  %p2153_p10 = pneg %p2152_p6 }
  0xaf   : > { %1877 = vmatpush3.bf16.msra.mxu1 %v1876_v18  ;;  %1821 = vmatprep.mubr.msk.f32.mxu0 %vm397_vm1, %v2566_v19 }
  0xb0   : > { %1878 = vmatprep.subr.bf16.mxu1 %v2268_v0 }
  0xb2   : > { %1822 = vmatmul.mubr.msk.f32.gmra.mrb[2].mxu0 %vm397_vm1, %v2573_v22 }
  0xb3   : > { %1880 = vmatpush3.bf16.msra.mxu1 %v1879_v23  ;;  %1824 = vmatprep.mubr.msk.f32.mxu0 %vm397_vm1, %v2576_v24 }
  0xb6   : > { %1859 = vmatmul.mubr.msk.f32.vlgmr.msra.gmra.mrb[0].mxu1 %vm599_vm2, %v392_v25  ;;  %1825 = vmatmul.mubr.msk.f32.gmra.mrb[4].mxu0 %vm397_vm1, %v2585_v26 }
  0xb7   : > { %1827 = vmatprep.mubr.msk.f32.mxu0 %vm397_vm1, %v2588_v27 }
  0xba   : > { %1828 = vmatmul.mubr.msk.f32.gmra.mrb[6].mxu0 %vm397_vm1, %v2596_v28 }
  0xbb   : > { %1830 = vmatprep.mubr.msk.f32.mxu0 %vm397_vm1, %v2599_v29 }
  0xbe   : > { %1831 = vmatmul.mubr.msk.f32.gmra.mrb[8].mxu0 %vm397_vm1, %v2606_v30 }
  0xbf   : > { %1833 = vmatprep.mubr.msk.f32.mxu0 %vm397_vm1, %v2609_v31 }
  0xc2   : > { %1834 = vmatmul.mubr.msk.f32.gmra.mrb[10].mxu0 %vm397_vm1, %v2616_v32 }
  0xc3   : > { %1836 = vmatprep.mubr.msk.f32.mxu0 %vm397_vm1, %v2619_v33 }
  0xc6   : > { %1837 = vmatmul.mubr.msk.f32.gmra.mrb[12].mxu0 %vm397_vm1, %v2626_v34 }
  0xc7   : > { %1839 = vmatprep.mubr.msk.f32.mxu0 %vm397_vm1, %v2629_v35 }
  0xca   : > { %1840 = vmatmul.mubr.msk.f32.gmra.mrb[14].mxu0 %vm397_vm1, %v391_v36 }
 0x181   : > { %v1820_v40 = vpop.f32.mrb[0].mxu0 }
 0x182   : > { %v512_v43 = vpop.f32.mrb[1].mxu0 }
 0x185   : > { %v1823_v44 = vpop.f32.mrb[2].mxu0 }
 0x186   : > { %v522_v46 = vpop.f32.mrb[3].mxu0 }
 0x189   : > { %v669_v47 = vpop.f32.mrb[0].mxu1  ;;  %v1826_v48 = vpop.f32.mrb[4].mxu0 }
 0x18a   : > { %v674_v49 = vcombine.high %v669_v47, %v669_v47  ;;  %v681_v50 = vrot.slane %v669_v47, %v680_v45  ;;  %v1860_v52 = vpop.f32.mrb[1].mxu1  ;;  %v532_v53 = vpop.f32.mrb[5].mxu0 }
 0x18c   : > { %v688_v54 = vrot.slane %v674_v49, %v680_v45  ;;  %v689_v55 = vcombine.high %v681_v50, %v681_v50  ;;  %v697_v56 = vrot.slane %v681_v50, %v680_v45 }
 0x18d   : > { %v1829_v57 = vpop.f32.mrb[6].mxu0 }
 0x18e   : > { %v690_v58 = vcombine.high %v688_v54, %v688_v54  ;;  %v726_v59 = vrot.slane %v697_v56, %v2642_v51  ;;  %v711_v60 = vrot.slane %v689_v55, %v680_v45  ;;  %v719_v61 = vcombine.high %v697_v56, %v697_v56  ;;  %v542_v62 = vpop.f32.mrb[7].mxu0 }
 0x18f   : > { %v704_v0 = vrot.slane %v688_v54, %v680_v45 }
 0x190   : > { %v764_v1 = vadd.f32 %v1820_v40, %v726_v59  ;;  %v763_v2 = vadd.f32 %v726_v59, %v512_v43  ;;  %v730_v3 = vrot.slane %v711_v60, %v2642_v51  ;;  %v734_v4 = vrot.slane %v719_v61, %v2642_v51 }
 0x191   : > { %v721_v5 = vcombine.high %v711_v60, %v711_v60  ;;  %v1832_v6 = vpop.f32.mrb[8].mxu0  ;;  %v742_v7 = vrot.slane %v704_v0, %v2642_v51  ;;  %v718_v8 = vrot.slane %v690_v58, %v680_v45  ;;  %v720_v9 = vcombine.high %v704_v0, %v704_v0  ;;  %v2669_v60 = vld [vmem:[%s3169_s5] ss:$0 sm:$0xff] }
 0x192   : > { %v787_v10 = vadd.f32 %v2648_v63, %v764_v1  ;;  %v786_v11 = vadd.f32 %v2648_v63, %v763_v2  ;;  %v766_v12 = vadd.f32 %v1823_v44, %v730_v3  ;;  %v765_v14 = vadd.f32 %v730_v3, %v522_v46  ;;  %v552_v15 = vpop.f32.mrb[9].mxu0 }
 0x193   : > { %v768_v16 = vadd.f32 %v1826_v48, %v734_v4  ;;  %v767_v18 = vadd.f32 %v734_v4, %v532_v53  ;;  %v738_v20 = vrot.slane %v721_v5, %v2642_v51  ;;  %v772_v21 = vadd.f32 %v1832_v6, %v742_v7 }
 0x194   : > { %1967 = vtanh.f32 %v787_v10  ;;  %v789_v23 = vadd.f32 %v2648_v63, %v766_v12  ;;  %v788_v25 = vadd.f32 %v2648_v63, %v765_v14  ;;  %v771_v36 = vadd.f32 %v742_v7, %v552_v15 }
 0x195   : > { %1969 = vtanh.f32 %v786_v11  ;;  %v790_v37 = vadd.f32 %v2648_v63, %v767_v18  ;;  %v770_v38 = vadd.f32 %v1829_v57, %v738_v20  ;;  %v1835_v40 = vpop.f32.mrb[10].mxu0  ;;  %v769_v41 = vadd.f32 %v738_v20, %v542_v62 }
 0x196   : > { %1971 = vtanh.f32 %v789_v23  ;;  %v562_v43 = vpop.f32.mrb[11].mxu0  ;;  %v791_v44 = vadd.f32 %v2648_v63, %v768_v16  ;;  %v746_v45 = vrot.slane %v718_v8, %v2642_v51  ;;  %v750_v46 = vrot.slane %v720_v9, %v2642_v51 }
 0x197   : > { %1973 = vtanh.f32 %v788_v25  ;;  %v722_v47 = vcombine.high %v718_v8, %v718_v8  ;;  %v792_v48 = vadd.f32 %v2648_v63, %v769_v41  ;;  %v795_v55 = vadd.f32 %v2648_v63, %v772_v21 }
 0x198   : > { %1975 = vtanh.f32 %v790_v37  ;;  %v774_v49 = vadd.f32 %v1835_v40, %v746_v45  ;;  %v773_v50 = vadd.f32 %v746_v45, %v562_v43  ;;  %v794_v58 = vadd.f32 %v2648_v63, %v771_v36 }
 0x199   : > { %v1838_v52 = vpop.f32.mrb[12].mxu0  ;;  %1977 = vtanh.f32 %v791_v44  ;;  %v754_v57 = vrot.slane %v722_v47, %v2642_v51  ;;  %v793_v2 = vadd.f32 %v2648_v63, %v770_v38 }
 0x19a   : > { %v776_v53 = vadd.f32 %v1838_v52, %v750_v46  ;;  %v572_v54 = vpop.f32.mrb[13].mxu0  ;;  %1979 = vtanh.f32 %v792_v48  ;;  %v796_v7 = vadd.f32 %v2648_v63, %v773_v50  ;;  %v797_v12 = vadd.f32 %v2648_v63, %v774_v49 }
 0x19b   : > { %v775_v56 = vadd.f32 %v750_v46, %v572_v54  ;;  %1981 = vtanh.f32 %v795_v55 }
 0x19c   : > { %1983 = vtanh.f32 %v794_v58  ;;  %v799_v25 = vadd.f32 %v2648_v63, %v776_v53 }
 0x19d   : > { %v1841_v59 = vpop.f32.mrb[14].mxu0  ;;  %1985 = vtanh.f32 %v793_v2  ;;  %v798_v18 = vadd.f32 %v2648_v63, %v775_v56 }
 0x19e   : > { %v1968_v61 = vpop.eup %1967  ;;  %v778_v62 = vadd.f32 %v1841_v59, %v754_v57  ;;  %v582_v0 = vpop.f32.mrb[15].mxu0  ;;  %1987 = vtanh.f32 %v796_v7 }
 0x19f   : > { %v1970_v1 = vpop.eup %1969  ;;  %v777_v3 = vadd.f32 %v754_v57, %v582_v0  ;;  %v826_v10 = vmul.f32 %v1968_v61, %v2669_v60  ;;  %1989 = vtanh.f32 %v797_v12 }
 0x1a0   : > { %v1972_v4 = vpop.eup %1971  ;;  %v825_v5 = vmul.f32 %v1970_v1, %v2669_v60  ;;  %1991 = vtanh.f32 %v798_v18  ;;  %v801_v45 = vadd.f32 %v2648_v63, %v778_v62 }
 0x1a1   : > { %v1974_v6 = vpop.eup %1973  ;;  %v828_v15 = vmul.f32 %v1972_v4, %v2669_v60  ;;  %v844_v20 = vsel %vm599_vm2, %v826_v10, 0.0  ;;  %v800_v40 = vadd.f32 %v2648_v63, %v777_v3  ;;  %1993 = vtanh.f32 %v799_v25 }
 0x1a2   : > { %v841_v8 = vsel %vm599_vm2, %v825_v5, 0.0  ;;  %v827_v9 = vmul.f32 %v1974_v6, %v2669_v60  ;;  %v1976_v11 = vpop.eup %1975 }
 0x1a3   : > { %842 = vadd.xlane.f32.xlu0 %v841_v8  ;;  %v1978_v16 = vpop.eup %1977  ;;  %v829_v21 = vmul.f32 %v1976_v11, %v2669_v60  ;;  %v850_v36 = vsel %vm599_vm2, %v828_v15, 0.0  ;;  %1995 = vtanh.f32 %v800_v40 }
 0x1a4   : > { %v847_v14 = vsel %vm599_vm2, %v827_v9, 0.0  ;;  %v1980_v23 = vpop.eup %1979  ;;  %v830_v37 = vmul.f32 %v1978_v16, %v2669_v60  ;;  %1997 = vtanh.f32 %v801_v45 }
 0x1a5   : > { %848 = vadd.xlane.f32.xlu1 %v847_v14  ;;  %v1982_v38 = vpop.eup %1981  ;;  %v853_v41 = vsel %vm599_vm2, %v829_v21, 0.0  ;;  %v831_v43 = vmul.f32 %v1980_v23, %v2669_v60 }
 0x1a6   : > { %v1984_v44 = vpop.eup %1983  ;;  %v856_v46 = vsel %vm599_vm2, %v830_v37, 0.0  ;;  %v834_v47 = vmul.f32 %v1982_v38, %v2669_v60 }
 0x1a7   : > { %845 = vadd.xlane.f32.xlu0 %v844_v20  ;;  %v1986_v48 = vpop.eup %1985  ;;  %v859_v49 = vsel %vm599_vm2, %v831_v43, 0.0  ;;  %v833_v50 = vmul.f32 %v1984_v44, %v2669_v60 }
 0x1a8   : > { %v1988_v52 = vpop.eup %1987  ;;  %v868_v53 = vsel %vm599_vm2, %v834_v47, 0.0  ;;  %v832_v54 = vmul.f32 %v1986_v48, %v2669_v60 }
 0x1a9   : > { %851 = vadd.xlane.f32.xlu1 %v850_v36  ;;  %v1990_v63 = vpop.eup %1989  ;;  %v865_v55 = vsel %vm599_vm2, %v833_v50, 0.0  ;;  %v835_v56 = vmul.f32 %v1988_v52, %v2669_v60 }
 0x1aa   : > { %v1992_v57 = vpop.eup %1991  ;;  %v862_v58 = vsel %vm599_vm2, %v832_v54, 0.0  ;;  %v836_v59 = vmul.f32 %v1990_v63, %v2669_v60 }
 0x1ab   : > { %854 = vadd.xlane.f32.xlu0 %v853_v41  ;;  %v1994_v61 = vpop.eup %1993  ;;  %v871_v62 = vsel %vm599_vm2, %v835_v56, 0.0  ;;  %v837_v0 = vmul.f32 %v1992_v57, %v2669_v60 }
 0x1ac   : > { %v874_v2 = vsel %vm599_vm2, %v836_v59, 0.0  ;;  %v838_v3 = vmul.f32 %v1994_v61, %v2669_v60 }
 0x1ad   : > { %857 = vadd.xlane.f32.xlu1 %v856_v46  ;;  %v1996_v1 = vpop.eup %1995  ;;  %v877_v5 = vsel %vm599_vm2, %v837_v0, 0.0 }
 0x1ae   : > { %v1998_v4 = vpop.eup %1997  ;;  %v839_v6 = vmul.f32 %v1996_v1, %v2669_v60  ;;  %v880_v7 = vsel %vm599_vm2, %v838_v3, 0.0 }
 0x1af   : > { %860 = vadd.xlane.f32.xlu0 %v859_v49  ;;  %v840_v8 = vmul.f32 %v1998_v4, %v2669_v60  ;;  %v906_v60 = vand.u32 127, %v678_v39 }
 0x1b0   : > { %v883_v9 = vsel %vm599_vm2, %v839_v6, 0.0 }
 0x1b1   : > { %869 = vadd.xlane.f32.xlu1 %v868_v53  ;;  %v886_v10 = vsel %vm599_vm2, %v840_v8, 0.0  ;;  %v911_v21 = vadd.s32 4294967288, %v906_v60  ;;  %v2735_v38 = vsub.s32 %v906_v60, %v2638_v42 }
 0x1b3   : > { %866 = vadd.xlane.f32.xlu0 %v865_v55  ;;  %v2730_v36 = vsub.s32 %v911_v21, %v2638_v42 }
 0x1b5   : > { %863 = vadd.xlane.f32.xlu1 %v862_v58 }
 0x1b7   : > { %872 = vadd.xlane.f32.xlu0 %v871_v62 }
 0x1b9   : > { %875 = vadd.xlane.f32.xlu1 %v874_v2 }
 0x1bb   : > { %878 = vadd.xlane.f32.xlu0 %v877_v5 }
 0x1bd   : > { %881 = vadd.xlane.f32.xlu1 %v880_v7 }
 0x1bf   : > { %884 = vadd.xlane.f32.xlu0 %v883_v9 }
 0x1c1   : > { %887 = vadd.xlane.f32.xlu1 %v886_v10 }
 0x230   : > { %v2710_v11 = vpop.xlane.xlu0 %842 }
 0x231   : > { %v910_v48 = vrot.slane %v2710_v11, %v2735_v38 }
 0x232   : > { %v2712_v12 = vpop.xlane.xlu1 %848 }
 0x233   : > { %v921_v43 = vrot.slane %v2712_v12, %v2735_v38 }
 0x234   : > { %v2714_v14 = vpop.xlane.xlu0 %845 }
 0x235   : > { %v915_v44 = vrot.slane %v2714_v14, %v2730_v36 }
 0x236   : > { %v2716_v15 = vpop.xlane.xlu1 %851 }
 0x237   : > { %v925_v40 = vrot.slane %v2716_v15, %v2730_v36  ;;  %v917_v54 = vsel %vm916_vm3, %v915_v44, %v910_v48  ;;  %v2272_v44 = vmov 0  }
 0x238   : > { %v2718_v16 = vpop.xlane.xlu0 %854  ;;  %1966 = vset.pattern.permute.xlu0 %v2272_v44  ;;  %1965 = vset.pattern.permute.xlu1 %v2272_v44 }
 0x239   : > { %v930_v46 = vrot.slane %v2718_v16, %v2735_v38  ;;  %v926_v49 = vsel %vm916_vm3, %v925_v40, %v921_v43 }
 0x23a   : > { %v2720_v18 = vpop.xlane.xlu1 %857  ;;  %v982_v56 = vsel %vm981_vm4, %v926_v49, %v917_v54 }
 0x23b   : > { %v934_v39 = vrot.slane %v2720_v18, %v2730_v36 }
 0x23c   : > { %v2723_v20 = vpop.xlane.xlu0 %860 }
 0x23d   : > { %v939_v50 = vrot.slane %v2723_v20, %v2735_v38  ;;  %v935_v52 = vsel %vm916_vm3, %v934_v39, %v930_v46 }
 0x23e   : > { %v2725_v23 = vpop.xlane.xlu1 %869  ;;  %v984_v59 = vsel %vm983_vm5, %v935_v52, %v982_v56  ;;  %v3179_v56 = vsub.s32 6, %v2638_v42 }
 0x23f   : > { %v952_v0 = vrot.slane %v2725_v23, %v2730_v36 }
 0x240   : > { %v2727_v25 = vpop.xlane.xlu0 %866 }
 0x241   : > { %v948_v57 = vrot.slane %v2727_v25, %v2735_v38 }
 0x242   : > { %v2732_v37 = vpop.xlane.xlu1 %863 }
 0x243   : > { %v943_v45 = vrot.slane %v2732_v37, %v2730_v36  ;;  %v953_v5 = vsel %vm916_vm3, %v952_v0, %v948_v57 }
 0x244   : > { %v2741_v41 = vpop.xlane.xlu0 %872 }
 0x245   : > { %v944_v63 = vsel %vm916_vm3, %v943_v45, %v939_v50  ;;  %v957_v61 = vrot.slane %v2741_v41, %v2735_v38  ;;  %v1007_v45 = vsub.s32 1, %v2638_v42  ;;  %v3180_v50 = vsub.s32 5, %v2638_v42 }
 0x246   : > { %v2751_v47 = vpop.xlane.xlu1 %875  ;;  %v986_v1 = vsel %vm985_vm6, %v944_v63, %v984_v59  ;;  %v1011_v63 = vsub.s32 2, %v2638_v42 }
 0x247   : > { %v961_v55 = vrot.slane %v2751_v47, %v2730_v36  ;;  %v988_v10 = vsel %vm987_vm7, %v953_v5, %v986_v1 }
 0x248   : > { %v2759_v53 = vpop.xlane.xlu0 %878 }
 0x249   : > { %v966_v2 = vrot.slane %v2759_v53, %v2735_v38  ;;  %v962_v4 = vsel %vm916_vm3, %v961_v55, %v957_v61 }
 0x24a   : > { %v2768_v58 = vpop.xlane.xlu1 %881  ;;  %v990_v60 = vsel %vm989_vm8, %v962_v4, %v988_v10 }
 0x24b   : > { %v970_v62 = vrot.slane %v2768_v58, %v2730_v36 }
 0x24c   : > { %v2780_v3 = vpop.xlane.xlu0 %884 }
 0x24d   : > { %v971_v7 = vsel %vm916_vm3, %v970_v62, %v966_v2  ;;  %v975_v8 = vrot.slane %v2780_v3, %v2735_v38  ;;  %v1015_v2 = vsub.s32 3, %v2638_v42 }
 0x24e   : > { %v2784_v6 = vpop.xlane.xlu1 %887  ;;  %v992_v40 = vsel %vm991_vm9, %v971_v7, %v990_v60 }
 0x24f   : > { %v979_v9 = vrot.slane %v2784_v6, %v2730_v36 }
 0x251   : > { %v980_v21 = vsel %vm916_vm3, %v979_v9, %v975_v8 }
 0x252   : > { %v994_v39 = vsel %vm993_vm10, %v980_v21, %v992_v40 }
 0x253   : > { %v997_v43 = vsel %vm996_vm11, %v994_v39, -inf }
 0x254   : > { %998 = vmax.xlane.f32.xlu0 %v997_v43 }
 0x2e1   : > { %v999_v46 = vpop.xlane.xlu0 %998 }
 0x2e2   : > { %v1004_v48 = vrot.slane %v999_v46, %v2642_v51  ;;  %v1008_v49 = vrot.slane %v999_v46, %v1007_v45  ;;  %v2809_v57 = vrot.slane %v999_v46, %v3180_v50  ;;  %v1012_v62 = vrot.slane %v999_v46, %v1011_v63 }
 0x2e3   : > { %v1016_v9 = vrot.slane %v999_v46, %v1015_v2 }
 0x2e4   : > { %v1041_v52 = vsub.f32 %v2710_v11, %v1004_v48  ;;  %v1042_v54 = vsub.f32 %v2714_v14, %v1004_v48  ;;  %v1043_v55 = vsub.f32 %v2712_v12, %v1008_v49  ;;  %v1044_v0 = vsub.f32 %v2716_v15, %v1008_v49 }
 0x2e5   : > { %v1031_v14 = vsub.s32 7, %v2638_v42  ;;  %v2817_v12 = vrot.slane %v999_v46, %v3179_v56  ;;  %v1051_v1 = vsub.f32 %v2741_v41, %v2809_v57  ;;  %v1045_v4 = vsub.f32 %v2718_v16, %v1012_v62 }
 0x2e6   : > { %v1057_v59 = vmul.f32 1.442695, %v1041_v52  ;;  %v1059_v61 = vmul.f32 1.442695, %v1042_v54  ;;  %v1061_v11 = vmul.f32 1.442695, %v1043_v55  ;;  %v1046_v10 = vsub.f32 %v2720_v18, %v1012_v62 }
 0x2e7   : > { %v1063_v5 = vmul.f32 1.442695, %v1044_v0  ;;  %v1032_v15 = vrot.slane %v999_v46, %v1031_v14  ;;  %v1053_v7 = vsub.f32 %v2759_v53, %v2817_v12  ;;  %v1077_v8 = vmul.f32 1.442695, %v1051_v1 }
 0x2e8   : > { %1999 = vpow2.f32 %v1057_v59  ;;  %v1065_v41 = vmul.f32 1.442695, %v1045_v4  ;;  %v1019_v53 = vsub.s32 4, %v2638_v42  ;;  %v1047_v39 = vsub.f32 %v2723_v20, %v1016_v9 }
 0x2e9   : > { %2001 = vpow2.f32 %v1059_v61  ;;  %v1055_v16 = vsub.f32 %v2780_v3, %v1032_v15  ;;  %v1081_v21 = vmul.f32 1.442695, %v1053_v7  ;;  %v1067_v43 = vmul.f32 1.442695, %v1046_v10 }
 0x2ea   : > { %2003 = vpow2.f32 %v1061_v11  ;;  %v1020_v3 = vrot.slane %v999_v46, %v1019_v53  ;;  %v1048_v48 = vsub.f32 %v2732_v37, %v1016_v9  ;;  %v1069_v49 = vmul.f32 1.442695, %v1047_v39 }
 0x2eb   : > { %2005 = vpow2.f32 %v1063_v5  ;;  %v1085_v44 = vmul.f32 1.442695, %v1055_v16  ;;  %v1052_v0 = vsub.f32 %v2751_v47, %v2809_v57  ;;  %v1056_v7 = vsub.f32 %v2784_v6, %v1032_v15 }
 0x2ec   : > { %2007 = vpow2.f32 %v1077_v8  ;;  %v1049_v54 = vsub.f32 %v2727_v25, %v1020_v3  ;;  %v1071_v55 = vmul.f32 1.442695, %v1048_v48  ;;  %v1050_v46 = vsub.f32 %v2725_v23, %v1020_v3 }
 0x2ed   : > { %2009 = vpow2.f32 %v1065_v41  ;;  %v1054_v23 = vsub.f32 %v2768_v58, %v2817_v12  ;;  %v1079_v4 = vmul.f32 1.442695, %v1052_v0  ;;  %v1087_v8 = vmul.f32 1.442695, %v1056_v7 }
 0x2ee   : > { %2011 = vpow2.f32 %v1081_v21  ;;  %v1073_v61 = vmul.f32 1.442695, %v1049_v54  ;;  %v1075_v11 = vmul.f32 1.442695, %v1050_v46 }
 0x2ef   : > { %2013 = vpow2.f32 %v1067_v43  ;;  %v1083_v47 = vmul.f32 1.442695, %v1054_v23 }
 0x2f0   : > { %2015 = vpow2.f32 %v1085_v44 }
 0x2f1   : > { %2017 = vpow2.f32 %v1069_v49 }
 0x2f2   : > { %v2830_v60 = vpop.eup %1999  ;;  %2019 = vpow2.f32 %v1071_v55 }
 0x2f3   : > { %v2833_v40 = vpop.eup %2001  ;;  %1106 = vperm.xlu1 %1965, %v2830_v60   ;;  %2021 = vpow2.f32 %v1073_v61 }
 0x2f4   : > { %1109 = vperm.xlu0 %1966, %v2833_v40   ;;  %v2839_v18 = vpop.eup %2003  ;;  %2023 = vpow2.f32 %v1075_v11 }
 0x2f5   : > { %v2845_v52 = vpop.eup %2005  ;;  %2025 = vpow2.f32 %v1079_v4 }
 0x2f6   : > { %v2848_v20 = vpop.eup %2007  ;;  %2027 = vpow2.f32 %v1083_v47 }
 0x2f7   : > { %1112 = vperm.xlu1 %1965, %v2839_v18   ;;  %v2852_v59 = vpop.eup %2009  ;;  %2029 = vpow2.f32 %v1087_v8 }
 0x2f8   : > { %1136 = vperm.xlu0 %1966, %v2848_v20   ;;  %v2855_v37 = vpop.eup %2011 }
 0x2f9   : > { %v2859_v62 = vpop.eup %2013 }
 0x2fa   : > { %v2862_v25 = vpop.eup %2015 }
 0x2fb   : > { %1115 = vperm.xlu1 %1965, %v2845_v52   ;;  %v2867_v1 = vpop.eup %2017 }
 0x2fc   : > { %1142 = vperm.xlu0 %1966, %v2855_v37   ;;  %v2872_v5 = vpop.eup %2019 }
 0x2fd   : > { %v2876_v57 = vpop.eup %2021 }
 0x2fe   : > { %v2879_v9 = vpop.eup %2023 }
 0x2ff   : > { %1118 = vperm.xlu1 %1965, %v2852_v59   ;;  %v2882_v58 = vpop.eup %2025 }
 0x300   : > { %1148 = vperm.xlu0 %1966, %v2862_v25   ;;  %v2885_v12 = vpop.eup %2027 }
 0x301   : > { %v2888_v6 = vpop.eup %2029 }
 0x303   : > { %1121 = vperm.xlu1 %1965, %v2859_v62  }
 0x307   : > { %1124 = vperm.xlu1 %1965, %v2867_v1  }
 0x30b   : > { %1127 = vperm.xlu1 %1965, %v2872_v5  }
 0x30f   : > { %1130 = vperm.xlu1 %1965, %v2876_v57  }
 0x313   : > { %1133 = vperm.xlu1 %1965, %v2879_v9  }
 0x317   : > { %1139 = vperm.xlu1 %1965, %v2882_v58  }
 0x31b   : > { %1145 = vperm.xlu1 %1965, %v2885_v12  }
 0x31f   : > { %1151 = vperm.xlu1 %1965, %v2888_v6  }
 0x372   : > { %v1107_v15 = vpop.permute.xlu1 %1106 }
 0x373   : > { %v1110_v43 = vpop.permute.xlu0 %1109  ;;  %v1156_v11 = vrot.slane %v1107_v15, %v2735_v38 }
 0x374   : > { %v1160_v0 = vrot.slane %v1110_v43, %v2730_v36 }
 0x376   : > { %v1113_v10 = vpop.permute.xlu1 %1112  ;;  %v1161_v15 = vsel %vm916_vm3, %v1160_v0, %v1156_v11 }
 0x377   : > { %v1137_v48 = vpop.permute.xlu0 %1136  ;;  %v1165_v23 = vrot.slane %v1113_v10, %v2735_v38 }
 0x378   : > { %v1201_v10 = vrot.slane %v1137_v48, %v2735_v38 }
 0x37a   : > { %v1116_v41 = vpop.permute.xlu1 %1115 }
 0x37b   : > { %v1169_v54 = vrot.slane %v1116_v41, %v2730_v36  ;;  %v1143_v55 = vpop.permute.xlu0 %1142 }
 0x37d   : > { %v1170_v8 = vsel %vm916_vm3, %v1169_v54, %v1165_v23 }
 0x37e   : > { %v1119_v16 = vpop.permute.xlu1 %1118  ;;  %v1225_v54 = vsel %vm981_vm4, %v1170_v8, %v1161_v15 }
 0x37f   : > { %v1174_v7 = vrot.slane %v1119_v16, %v2735_v38 }
 0x382   : > { %v1122_v21 = vpop.permute.xlu1 %1121 }
 0x383   : > { %v1178_v46 = vrot.slane %v1122_v21, %v2730_v36 }
 0x385   : > { %v1179_v21 = vsel %vm916_vm3, %v1178_v46, %v1174_v7 }
 0x386   : > { %v1125_v39 = vpop.permute.xlu1 %1124  ;;  %v1226_v46 = vsel %vm983_vm5, %v1179_v21, %v1225_v54 }
 0x387   : > { %v1183_v41 = vrot.slane %v1125_v39, %v2735_v38  ;;  %v1149_v39 = vpop.permute.xlu0 %1148 }
 0x388   : > { %v1219_v11 = vrot.slane %v1149_v39, %v2735_v38 }
 0x38a   : > { %v1128_v44 = vpop.permute.xlu1 %1127 }
 0x38b   : > { %v1187_v4 = vrot.slane %v1128_v44, %v2730_v36 }
 0x38d   : > { %v1188_v44 = vsel %vm916_vm3, %v1187_v4, %v1183_v41 }
 0x38e   : > { %v1131_v3 = vpop.permute.xlu1 %1130  ;;  %v1227_v23 = vsel %vm985_vm6, %v1188_v44, %v1226_v46 }
 0x38f   : > { %v1192_v43 = vrot.slane %v1131_v3, %v2735_v38 }
 0x392   : > { %v1134_v49 = vpop.permute.xlu1 %1133 }
 0x393   : > { %v1196_v47 = vrot.slane %v1134_v49, %v2730_v36  ;;  %v1210_v49 = vrot.slane %v1143_v55, %v2735_v38 }
 0x396   : > { %v1140_v61 = vpop.permute.xlu1 %1139 }
 0x397   : > { %v1205_v56 = vrot.slane %v1140_v61, %v2730_v36  ;;  %v1197_v61 = vsel %vm916_vm3, %v1196_v47, %v1192_v43 }
 0x399   : > { %v1206_v3 = vsel %vm916_vm3, %v1205_v56, %v1201_v10 }
 0x39a   : > { %v1146_v50 = vpop.permute.xlu1 %1145 }
 0x39b   : > { %v1214_v16 = vrot.slane %v1146_v50, %v2730_v36  ;;  %v1228_v50 = vsel %vm987_vm7, %v1197_v61, %v1227_v23 }
 0x39c   : > { %v1229_v4 = vsel %vm989_vm8, %v1206_v3, %v1228_v50 }
 0x39d   : > { %v1215_v0 = vsel %vm916_vm3, %v1214_v16, %v1210_v49 }
 0x39e   : > { %v1152_v48 = vpop.permute.xlu1 %1151  ;;  %v1230_v47 = vsel %vm991_vm9, %v1215_v0, %v1229_v4 }
 0x39f   : > { %v1223_v55 = vrot.slane %v1152_v48, %v2730_v36 }
 0x3a1   : > { %v1224_v7 = vsel %vm916_vm3, %v1223_v55, %v1219_v11 }
 0x3a2   : > { %v1231_v8 = vsel %vm993_vm10, %v1224_v7, %v1230_v47 }
 0x3a3   : > { %v1233_v56 = vsel %vm996_vm11, %v1231_v8, 0.0 }
 0x3a4   : > { %1234 = vadd.xlane.f32.xlu0 %v1233_v56 }
 0x431   : > { %v1235_v41 = vpop.xlane.xlu0 %1234 }
 0x432   : > { %2031 = vrcp.f32 %v1235_v41 }
 0x43c   : > { %v2032_v21 = vpop.eup %2031 }
 0x43d   : > { %v1257_v43 = vrot.slane %v2032_v21, %v1019_v53  ;;  %v1241_v15 = vrot.slane %v2032_v21, %v2642_v51  ;;  %v1269_v16 = vrot.slane %v2032_v21, %v1031_v14  ;;  %v1245_v39 = vrot.slane %v2032_v21, %v1007_v45 }
 0x43f   : > { %v1286_v10 = vmul.f32 %v2876_v57, %v1257_v43  ;;  %v1278_v44 = vmul.f32 %v2830_v60, %v1241_v15  ;;  %v1292_v49 = vmul.f32 %v2862_v25, %v1269_v16  ;;  %v1279_v54 = vmul.f32 %v2833_v40, %v1241_v15 }
 0x440   : > { %v1280_v51 = vmul.f32 %v2839_v18, %v1245_v39  ;;  %v1281_v53 = vmul.f32 %v2845_v52, %v1245_v39  ;;  %v1249_v60 = vrot.slane %v2032_v21, %v1011_v63  ;;  %v1253_v40 = vrot.slane %v2032_v21, %v1015_v2 }
 0x441   : > { %1336 = vperm.xlu0 %1966, %v1286_v10   ;;  %1296 = vperm.xlu1 %1965, %v1278_v44   ;;  %v1287_v52 = vmul.f32 %v2879_v9, %v1257_v43  ;;  %v3205_v63 = vsub.s32 5, %v2638_v42  ;;  %v3206_v2 = vsub.s32 6, %v2638_v42  ;;  %v1293_v9 = vmul.f32 %v2888_v6, %v1269_v16 }
 0x442   : > { %v1282_v14 = vmul.f32 %v2852_v59, %v1249_v60  ;;  %v1283_v25 = vmul.f32 %v2859_v62, %v1249_v60  ;;  %v1284_v45 = vmul.f32 %v2867_v1, %v1253_v40  ;;  %v1285_v18 = vmul.f32 %v2872_v5, %v1253_v40 }
 0x443   : > { %v1261_v57 = vrot.slane %v2032_v21, %v3205_v63  ;;  %v1265_v61 = vrot.slane %v2032_v21, %v3206_v2 }
 0x445   : > { %1366 = vperm.xlu0 %1966, %v1292_v49   ;;  %1301 = vperm.xlu1 %1965, %v1279_v54   ;;  %v1288_v59 = vmul.f32 %v2848_v20, %v1261_v57  ;;  %v1289_v62 = vmul.f32 %v2882_v58, %v1261_v57  ;;  %v1290_v1 = vmul.f32 %v2855_v37, %v1265_v61 }
 0x446   : > { %v1291_v5 = vmul.f32 %v2885_v12, %v1265_v61 }
 0x449   : > { %1306 = vperm.xlu1 %1965, %v1280_v51  }
 0x44d   : > { %1311 = vperm.xlu1 %1965, %v1281_v53  }
 0x451   : > { %1316 = vperm.xlu1 %1965, %v1282_v14  }
 0x455   : > { %1321 = vperm.xlu1 %1965, %v1283_v25  }
 0x459   : > { %1326 = vperm.xlu1 %1965, %v1284_v45  }
 0x45d   : > { %1331 = vperm.xlu1 %1965, %v1285_v18  }
 0x461   : > { %1341 = vperm.xlu1 %1965, %v1287_v52  }
 0x465   : > { %1346 = vperm.xlu1 %1965, %v1288_v59  }
 0x469   : > { %1351 = vperm.xlu1 %1965, %v1289_v62  }
 0x46d   : > { %1356 = vperm.xlu1 %1965, %v1290_v1  }
 0x471   : > { %1361 = vperm.xlu1 %1965, %v1291_v5  }
 0x475   : > { %1371 = vperm.xlu1 %1965, %v1293_v9  }
 0x4c0   : > { %v2954_v46 = vpop.permute.xlu1 %1296  ;;  %v2980_v4 = vpop.permute.xlu0 %1336 }
 0x4c1   : > { %v1374_v12 = vmul.f32 %v2954_v46, %v2558_v13  ;;  %v1382_v15 = vmul.f32 %v2980_v4, %v2599_v29  ;;  %v1518_v14 = vrot.slane %v2980_v4, %v2735_v38  ;;  %v1482_v25 = vrot.slane %v2954_v46, %v2735_v38 }
 0x4c3   : > { %v1390_v50 = vsel %vm397_vm1, %v1374_v12, 0.0  ;;  %v1426_v51 = vsel %vm397_vm1, %v1382_v15, 0.0 }
 0x4c4   : > { %v2956_v3 = vpop.permute.xlu1 %1301  ;;  %v2999_v10 = vpop.permute.xlu0 %1366 }
 0x4c5   : > { %v1375_v37 = vmul.f32 %v2956_v3, %v2563_v17  ;;  %v1486_v63 = vrot.slane %v2956_v3, %v2730_v36  ;;  %v1545_v59 = vrot.slane %v2999_v10, %v2735_v38 }
 0x4c7   : > { %v1391_v48 = vsel %vm397_vm1, %v1375_v37, 0.0 }
 0x4c8   : > { %v2958_v20 = vpop.permute.xlu1 %1306  ;;  %v1392_v17 = vadd.f32 %v1391_v48, %v1390_v50 }
 0x4c9   : > { %v1376_v11 = vmul.f32 %v2958_v20, %v2566_v19  ;;  %v1491_v61 = vrot.slane %v2958_v20, %v2735_v38 }
 0x4ca   : > { %v1393_v41 = vrot.slane %v1392_v17, 4 }
 0x4cb   : > { %v1399_v47 = vsel %vm397_vm1, %v1376_v11, 0.0 }
 0x4cc   : > { %v2960_v58 = vpop.permute.xlu1 %1311  ;;  %v1394_v39 = vadd.f32 %v1393_v41, %v1392_v17 }
 0x4cd   : > { %v1377_v0 = vmul.f32 %v2960_v58, %v2573_v22 }
 0x4ce   : > { %v1395_v52 = vrot.slane %v1394_v39, 2 }
 0x4cf   : > { %v1400_v7 = vsel %vm397_vm1, %v1377_v0, 0.0 }
 0x4d0   : > { %v2962_v42 = vpop.permute.xlu1 %1316  ;;  %v1401_v8 = vadd.f32 %v1400_v7, %v1399_v47  ;;  %v3031_v12 = vadd.f32 %v1395_v52, %v1394_v39 }
 0x4d1   : > { %v1378_v22 = vmul.f32 %v2962_v42, %v2576_v24 }
 0x4d2   : > { %v1402_v44 = vrot.slane %v1401_v8, 4 }
 0x4d3   : > { %v1408_v24 = vsel %vm397_vm1, %v1378_v22, 0.0 }
 0x4d4   : > { %v2964_v23 = vpop.permute.xlu1 %1321  ;;  %v1403_v40 = vadd.f32 %v1402_v44, %v1401_v8 }
 0x4d5   : > { %v1379_v13 = vmul.f32 %v2964_v23, %v2585_v26  ;;  %v1504_v62 = vrot.slane %v2964_v23, %v2730_v36  ;;  %v1487_v23 = vsel %vm916_vm3, %v1486_v63, %v1482_v25 }
 0x4d6   : > { %v1404_v46 = vrot.slane %v1403_v40, 2 }
 0x4d7   : > { %v1409_v21 = vsel %vm397_vm1, %v1379_v13, 0.0 }
 0x4d8   : > { %v2970_v6 = vpop.permute.xlu1 %1326  ;;  %v1410_v16 = vadd.f32 %v1409_v21, %v1408_v24  ;;  %v3044_v47 = vadd.f32 %v1404_v46, %v1403_v40 }
 0x4d9   : > { %v1380_v43 = vmul.f32 %v2970_v6, %v2588_v27 }
 0x4da   : > { %v1411_v45 = vrot.slane %v1410_v16, 4 }
 0x4db   : > { %v1417_v27 = vsel %vm397_vm1, %v1380_v43, 0.0 }
 0x4dc   : > { %v2978_v55 = vpop.permute.xlu1 %1331  ;;  %v1412_v3 = vadd.f32 %v1411_v45, %v1410_v16 }
 0x4dd   : > { %v1381_v19 = vmul.f32 %v2978_v55, %v2596_v28  ;;  %v1513_v20 = vrot.slane %v2978_v55, %v2730_v36 }
 0x4de   : > { %v1413_v55 = vrot.slane %v1412_v3, 2 }
 0x4df   : > { %v1418_v28 = vsel %vm397_vm1, %v1381_v19, 0.0 }
 0x4e0   : > { %v2990_v56 = vpop.permute.xlu1 %1341  ;;  %v1419_v29 = vadd.f32 %v1418_v28, %v1417_v27  ;;  %v1414_v27 = vadd.f32 %v1413_v55, %v1412_v3 }
 0x4e1   : > { %v1383_v26 = vmul.f32 %v2990_v56, %v2606_v30  ;;  %v1388_v30 = vmul.f32 %v2999_v10, %v2629_v35  ;;  %v1495_v35 = vrot.slane %v2960_v58, %v2730_v36  ;;  %v1522_v50 = vrot.slane %v2990_v56, %v2730_v36 }
 0x4e2   : > { %v1420_v2 = vrot.slane %v1419_v29, 4 }
 0x4e3   : > { %v1427_v49 = vsel %vm397_vm1, %v1383_v26, 0.0  ;;  %v1496_v0 = vsel %vm916_vm3, %v1495_v35, %v1491_v61  ;;  %v1523_v26 = vsel %vm916_vm3, %v1522_v50, %v1518_v14 }
 0x4e4   : > { %v1347_v54 = vpop.permute.xlu1 %1346  ;;  %v1428_v53 = vadd.f32 %v1427_v49, %v1426_v51  ;;  %v1421_v11 = vadd.f32 %v1420_v2, %v1419_v29  ;;  %v1551_v22 = vsel %vm981_vm4, %v1496_v0, %v1487_v23  ;;  %v2033_v51 = vld [vmem:[%s2534_s2 + $0x78] sm:$0xff]  ;;  %s2154_s2 = sshll.u32 %s2273_s15, 4  ;;  %s2155_s2 = int_to_ptr.vmem [resolvable:$false] %s2154_s2 }
 0x4e5   : > { %v1384_v60 = vmul.f32 %v1347_v54, %v2609_v31  ;;  %v3019_v31 = vsel %vm397_vm1, %v1388_v30, 0.0  ;;  %v1527_v56 = vrot.slane %v1347_v54, %v2735_v38  ;;  %s2156_s0 = scalar_lea.vmem %s2155_s2, 256  ;;  %p2157_p4 = scmp.lt.s32.totalorder %s3076_s20, %s2155_s2 }
 0x4e6   : > { %v1429_v1 = vrot.slane %v1428_v53, 4  ;;  %p2158_p5 = scmp.lt.s32.totalorder %s2156_s0, %s2150_s14 }
 0x4e7   : > { %v1435_v5 = vsel %vm397_vm1, %v1384_v60, 0.0 }
 0x4e8   : > { %v1352_v18 = vpop.permute.xlu1 %1351  ;;  %v1430_v17 = vadd.f32 %v1429_v1, %v1428_v53  ;;  %v1406_v53 = vrot.slane %v3044_v47, 1  ;;  %p2159_p3 = por %p2158_p5, %p2157_p4 }
 0x4e9   : > { %v1385_v57 = vmul.f32 %v1352_v18, %v2616_v32  ;;  %v1500_v32 = vrot.slane %v2962_v42, %v2735_v38  ;;  %v1509_v42 = vrot.slane %v2970_v6, %v2735_v38  ;;  %v1531_v7 = vrot.slane %v1352_v18, %v2730_v36 }
 0x4ea   : > { %v1431_v10 = vrot.slane %v1430_v17, 2  ;;  %p2160_p7 = pnand %p2159_p3, %p2153_p10 }
 0x4eb   : > { %v1436_v9 = vsel %vm397_vm1, %v1385_v57, 0.0  ;;  %v1505_v48 = vsel %vm916_vm3, %v1504_v62, %v1500_v32  ;;  %v1514_v41 = vsel %vm916_vm3, %v1513_v20, %v1509_v42  ;;  %v1532_v24 = vsel %vm916_vm3, %v1531_v7, %v1527_v56 }
 0x4ec   : > { %v1437_v58 = vadd.f32 %v1436_v9, %v1435_v5  ;;  %v1357_v37 = vpop.permute.xlu1 %1356  ;;  %v1552_v43 = vsel %vm983_vm5, %v1505_v48, %v1551_v22  ;;  %v1432_v40 = vadd.f32 %v1431_v10, %v1430_v17  ;;  %v1415_v62 = vrot.slane %v1414_v27, 1 }
 0x4ed   : > { %v1386_v13 = vmul.f32 %v1357_v37, %v2619_v33  ;;  %v1422_v33 = vrot.slane %v1421_v11, 2  ;;  %v1536_v15 = vrot.slane %v1357_v37, %v2735_v38 }
 0x4ee   : > { %v1438_v4 = vrot.slane %v1437_v58, 4 }
 0x4ef   : > { %v1444_v28 = vsel %vm397_vm1, %v1386_v13, 0.0  ;;  %v1423_v60 = vadd.f32 %v1422_v33, %v1421_v11 }
 0x4f0   : > { %v1439_v19 = vadd.f32 %v1438_v4, %v1437_v58  ;;  %v1362_v8 = vpop.permute.xlu1 %1361 }
 0x4f1   : > { %v1387_v21 = vmul.f32 %v1362_v8, %v2626_v34  ;;  %v1540_v6 = vrot.slane %v1362_v8, %v2730_v36  ;;  %v1553_v34 = vsel %vm985_vm6, %v1514_v41, %v1552_v43  ;;  %v1424_v2 = vrot.slane %v1423_v60, 1 }
 0x4f2   : > { %v1440_v16 = vrot.slane %v1439_v19, 2  ;;  %v1554_v38 = vsel %vm987_vm7, %v1523_v26, %v1553_v34 }
 0x4f3   : > { %v1445_v44 = vsel %vm397_vm1, %v1387_v21, 0.0  ;;  %v1541_v54 = vsel %vm916_vm3, %v1540_v6, %v1536_v15  ;;  %v1555_v14 = vsel %vm989_vm8, %v1532_v24, %v1554_v38 }
 0x4f4   : > { %v1446_v49 = vadd.f32 %v1445_v44, %v1444_v28  ;;  %v1372_v39 = vpop.permute.xlu1 %1371  ;;  %v1556_v45 = vsel %vm991_vm9, %v1541_v54, %v1555_v14 }
 0x4f5   : > { %v1389_v30 = vmul.f32 %v2033_v51, %v1372_v39  ;;  %v1549_v29 = vrot.slane %v1372_v39, %v2730_v36  ;;  %v1441_v36 = vadd.f32 %v1440_v16, %v1439_v19 }
 0x4f6   : > { %v1447_v25 = vrot.slane %v1446_v49, 4 }
 0x4f7   : > { %v1454_v18 = vsel %vm397_vm1, %v1389_v30, 0.0  ;;  %v1550_v52 = vsel %vm916_vm3, %v1549_v29, %v1545_v59  ;;  %v1397_v59 = vrot.slane %v3031_v12, 1 }
 0x4f8   : > { %v1448_v63 = vadd.f32 %v1447_v25, %v1446_v49  ;;  %v1455_v35 = vadd.f32 %v1454_v18, %v3019_v31  ;;  %v1557_v57 = vsel %vm993_vm10, %v1550_v52, %v1556_v45 }
 0x4f9   : > { %1559 = vst.msk [vmem:[%s374_s18] sm:$0xff] %vm996_vm11, %v1557_v57 }
 0x4fa   : > { %v1449_v61 = vrot.slane %v1448_v63, 2  ;;  %v1456_v1 = vrot.slane %v1455_v35, 4 }
 0x4fb   : > { %2163 = shalt.err (!%p2160_p7)
}
 0x4fc   : > { %s2164_s17 = scalar_lea.hbm %s3074_s21, 128  ;;  %s2168_s19 = scalar_lea.hbm %s3171_s7, 256 }
 0x4fd   : > { %p2165_p2 = scmp.ne.s32.totalorder %s3074_s21, %s2164_s17  ;;  %p2169_p0 = scmp.lt.u32.totalorder %s3074_s21, %s3171_s7 }
 0x4fe   : > { %p2170_p9 = scmp.lt.u32.totalorder %s2168_s19, %s2164_s17  ;;  %p2172_p1 = scmp.lt.u32.totalorder %s2164_s17, %s3074_s21 }
 0x4ff   : > { %p2166_p8 = pnand %p2165_p2, %p3207_p13 }
 0x500   : > { %p2171_p12 = por %p2170_p9, %p2169_p0 }
 0x501   : > { %p2167_p11 = pneg %p2166_p8 }
 0x502   : > { %p2173_p6 = por %p2172_p1, %p2171_p12 }
 0x504   : > { %p2174_p10 = pnand %p2173_p6, %p2167_p11 }
 0x506   : > { %2177 = shalt.err (!%p2174_p10)
}
 0x507   : > { %1894 = dma.vmem_to_hbm [thread:$0]  (%p3207_p13), %s3076_s20, 128, %s3074_s21, %s1566_s22   ;;  %v1433_v31 = vrot.slane %v1432_v40, 1  ;;  %v1407_v5 = vadd.f32 %v1406_v53, %v3044_v47  ;;  %v1442_v9 = vrot.slane %v1441_v36, 1  ;;  %v1450_v46 = vadd.f32 %v1449_v61, %v1448_v63 }
 0x508   : > { %v1457_v32 = vadd.f32 %v1456_v1, %v1455_v35  ;;  %v1416_v3 = vadd.f32 %v1415_v62, %v1414_v27  ;;  %v1398_v58 = vadd.f32 %v1397_v59, %v3031_v12  ;;  %v1425_v37 = vadd.f32 %v1424_v2, %v1423_v60  ;;  %s367_s18 = scalar_lea.vmem [#allocation10], %s2542_s9  ;;  %s3118_s21 = scalar_lea.hbm %s3170_s6, %s1775_s10 }
 0x509   : > { %v1451_v23 = vrot.slane %v1450_v46, 1  ;;  %v1434_v20 = vadd.f32 %v1433_v31, %v1432_v40  ;;  %v1443_v11 = vadd.f32 %v1442_v9, %v1441_v36  ;;  %s1579_s20 = sshll.u32 %s367_s18, 4  ;;  %s1561_s9 = scalar_lea.sflag [#allocation4], %s2530_s26  ;;  %s3120_s20 = int_to_ptr.vmem [resolvable:$true] %s1579_s20 }
 0x50a   : > { %v1458_v0 = vrot.slane %v1457_v32, 2  ;;  %v1470_v48 = vsel %vm981_vm4, %v1407_v5, %v1398_v58  ;;  %s2178_s22 = scalar_lea.vmem %s3120_s20, 128  ;;  %s2274_s28 = smov [#allocation10]  }
 0x50b   : > { %v1471_v4 = vsel %vm983_vm5, %v1416_v3, %v1470_v48  ;;  %v1452_v42 = vadd.f32 %v1451_v23, %v1450_v46  ;;  %p2179_p4 = scmp.ne.s32.totalorder %s3120_s20, %s2178_s22  ;;  %s2182_s14 = sshll.u32 %s2274_s28, 4  ;;  %s2183_s14 = int_to_ptr.vmem [resolvable:$false] %s2182_s14 }
 0x50c   : > { %v1459_v50 = vadd.f32 %v1458_v0, %v1457_v32  ;;  %v1472_v17 = vsel %vm985_vm6, %v1425_v37, %v1471_v4  ;;  %s2184_s10 = scalar_lea.vmem %s2183_s14, 256  ;;  %p2185_p7 = scmp.lt.s32.totalorder %s3120_s20, %s2183_s14 }
 0x50d   : > { %v1473_v12 = vsel %vm987_vm7, %v1434_v20, %v1472_v17  ;;  %p2180_p5 = pnand %p2179_p4, %p3207_p13  ;;  %p2186_p2 = scmp.lt.s32.totalorder %s2184_s10, %s2178_s22 }
 0x50e   : > { %v1460_v7 = vrot.slane %v1459_v50, 1  ;;  %v1474_v47 = vsel %vm989_vm8, %v1443_v11, %v1473_v12 }
 0x50f   : > { %v1475_v22 = vsel %vm991_vm9, %v1452_v42, %v1474_v47  ;;  %p2181_p3 = pneg %p2180_p5  ;;  %p2187_p8 = por %p2186_p2, %p2185_p7 }
 0x510   : > { %v1461_v13 = vadd.f32 %v1460_v7, %v1459_v50 }
 0x511   : > { %p2188_p11 = pnand %p2187_p8, %p2181_p3 }
 0x512   : > { %v1476_v55 = vsel %vm993_vm10, %v1461_v13, %v1475_v22 }
 0x513   : > { %1478 = vst.msk [vmem:[%s367_s18] sm:$0xff] %vm397_vm1, %v1476_v55 }
 0x514   : > { %2191 = shalt.err (!%p2188_p11)
}
 0x515   : > { %s2192_s26 = scalar_lea.hbm %s3118_s21, 128  ;;  %s2196_s0 = scalar_lea.hbm %s3170_s6, 256 }
 0x516   : > { %p2193_p0 = scmp.ne.s32.totalorder %s3118_s21, %s2192_s26  ;;  %p2197_p1 = scmp.lt.u32.totalorder %s3118_s21, %s3170_s6 }
 0x517   : > { %p2198_p6 = scmp.lt.u32.totalorder %s2196_s0, %s2192_s26  ;;  %p2200_p4 = scmp.lt.u32.totalorder %s2192_s26, %s3118_s21 }
 0x518   : > { %p2194_p9 = pnand %p2193_p0, %p3207_p13 }
 0x519   : > { %p2199_p10 = por %p2198_p6, %p2197_p1 }
 0x51a   : > { %p2195_p12 = pneg %p2194_p9 }
 0x51b   : > { %p2201_p5 = por %p2200_p4, %p2199_p10 }
 0x51d   : > { %p2202_p3 = pnand %p2201_p5, %p2195_p12 }
 0x51f   : > { %2205 = shalt.err (!%p2202_p3)
}
 0x520   : > { %1893 = dma.vmem_to_hbm [thread:$0]  (%p3207_p13), %s3120_s20, 128, %s3118_s21, %s1561_s9  }
 0x521 PF: > { %s1604_s30 = sand.u32 1, %s2248_s24   ;;  %p3208_p7 = scmp.ne.s32.totalorder %s3186_s8, 0 }
 0x522   : > { %p3209_p2 = scmp.ge.s32.totalorder %s2260_s27, 2  ;;  %s1605_s19 = scalar_lea.sflag [#allocation4], %s1604_s30 }
 0x524   : > { %p1912_p8 = pnand %p3209_p2, %p3208_p7 }
 0x526   : > { %2239 = dma.done.wait (!%p1912_p8), %s1605_s19, 128  }
 0x527   : > { %2241 = vsyncadd (!%p1912_p8), %s1605_s19, 4294967168  ;;  %s1614_s29 = scalar_lea.sflag [#allocation12], %s1604_s30 }
 0x528   : > { %2243 = dma.done.wait (!%p1912_p8), %s1614_s29, 128  }
 0x529   : > { %2245 = vsyncadd (!%p1912_p8), %s1614_s29, 4294967168  ;;  %s3210_s16 = sld [smem:[#allocation19_spill]]  ;;  %s3211_s26 = sld [smem:[#allocation20_spill]] }
 0x52a   : > { %p28_p13 = scmp.ge.s32.totalorder %s2431_s12, 4   ;;  %s3212_s24 = smov %s2252_s25 }
 0x52b   : > { %s3214_s27 = smov %s2431_s12 }
 0x52c   :  { %30 = sbr.rel (!%p28_p13) target bundleno = 14 (0xe), region = 127 }
 0x52f   : > { %s3213_s25 = smov %s3210_s16 }
 0x533   :  { %1619 = vsyncpa [#allocation3], 1 }
 0x534   :  { %1621 = vsyncpa [#allocation3 + $0x1], 1 }
 0x535   :  { %1622 = vsyncpa [#allocation6], 1 }
 0x536   :  { %1624 = vsyncpa [#allocation6 + $0x1], 1 }
 0x537   :  { %1625 = vsyncpa [#allocation9], 1 }
 0x538   :  { %1626 = vsyncpa [#allocation4], 1 }
 0x539   :  { %1628 = vsyncpa [#allocation4 + $0x1], 1 }
 0x53a   :  { %1629 = vsyncpa [#allocation12], 1 }
 0x53b   :  { %1631 = vsyncpa [#allocation12 + $0x1], 1 }

</bundles_post_ra>
